<compile_context>
chip_gen: v6e
topology: v6e:2x2x1
jax: 0.10.0
libtpu: 0.0.40
codegen_flags: <defaults>
</compile_context>

<pallas_src>
import jax
import jax.numpy as jnp
from jax.experimental import pallas as pl
from jax.experimental.pallas import tpu as pltpu

_EPS = 1e-5  # nn.LayerNorm default


# ----------------------------------------------------------------------------- kernel
def swin_block_kernel(xw_ref, g1_ref, b1_ref, g2_ref, b2_ref, wp_ref, bp_ref, out_ref):
    """xw_ref: (wpb, hw, C) block of windows.  Params are full-resident (constant maps)."""
    x = xw_ref[...].astype(jnp.float32)                   # (wpb, hw, C)
    wpb, hw, C = x.shape

    # --- self.norm: LayerNorm over channels C (per spatial position) -------------
    mu = jnp.mean(x, axis=-1, keepdims=True)
    xc = x - mu
    var = jnp.mean(xc * xc, axis=-1, keepdims=True)
    y = xc * jax.lax.rsqrt(var + _EPS)
    y = y * g1_ref[...] + b1_ref[...]                      # (1, C) broadcasts

    # --- SpatialMLP.LN: LayerNorm over hw, per (window, channel) ------------------
    # (equivalent to rearrange 'b hw c -> b c hw'; LN(hw); rearrange back)
    mu2 = jnp.mean(y, axis=1, keepdims=True)               # (wpb, 1, C)
    yc = y - mu2
    var2 = jnp.mean(yc * yc, axis=1, keepdims=True)
    z = yc * jax.lax.rsqrt(var2 + _EPS)
    z = z * g2_ref[...] + b2_ref[...]                      # (hw, 1) broadcasts

    # --- SpatialMLP.proj: Linear(C, C) + bias (MXU, bf16 operands, f32 acc) --------
    z2 = z.reshape(wpb * hw, C).astype(jnp.bfloat16)       # free reshape (leading axes)
    o = jnp.dot(z2, wp_ref[...], preferred_element_type=jnp.float32) + bp_ref[...]
    out_ref[...] = o.reshape(wpb, hw, C).astype(out_ref.dtype)


# ---------------------------------------------------------------------- layout helpers
def window_partition(x, ws):
    """(B, H, W, C) -> (B * H/ws * W/ws, ws*ws, C), matching the PyTorch helper."""
    B, H, W, C = x.shape
    x = x.reshape(B, H // ws, ws, W // ws, ws, C)
    x = x.transpose(0, 1, 3, 2, 4, 5)
    return x.reshape(B * (H // ws) * (W // ws), ws * ws, C)


def window_reverse(wins, ws, B, H, W):
    """(B * H/ws * W/ws, ws*ws, C) -> (B, H, W, C), matching the PyTorch helper."""
    C = wins.shape[-1]
    x = wins.reshape(B, H // ws, W // ws, ws, ws, C)
    x = x.transpose(0, 1, 3, 2, 4, 5)
    return x.reshape(B, H, W, C)


def _pick_windows_per_block(nw, hw, target_rows=512):
    """Largest divisor of nw keeping wpb*hw <= target_rows, with >=2 grid steps
    when possible (so both v7x TensorCores get work)."""
    best = 1
    for d in range(1, nw + 1):
        if nw % d:
            continue
        if d * hw > target_rows:
            break
        if nw > 1 and nw // d < 2:
            continue
        best = d
    return best


# -------------------------------------------------------------------------- wrapper
def swin_spatial_block(x, params, window_size, shift_size=0, windows_per_block=None):
    """x: (B, H, W, C) float32 -> (B, H, W, C) float32."""
    B, H, W, C = x.shape
    ws = window_size
    assert H % ws == 0 and W % ws == 0, "input resolution must be divisible by window_size"
    assert 0 <= shift_size < ws
    hw = ws * ws

    # LayerNorm(C) is position-wise, so it commutes with the cyclic shift and the window
    # partition; do the shift + partition first (XLA layout plumbing) and run all the
    # math inside the kernel.
    xs = x
    if shift_size > 0:
        xs = jnp.roll(xs, shift=(-shift_size, -shift_size), axis=(1, 2))
    xw = window_partition(xs, ws)                          # (NW, hw, C)
    nw = xw.shape[0]

    wpb = windows_per_block or _pick_windows_per_block(nw, hw)
    assert nw % wpb == 0
    grid = (nw // wpb,)

    # Pre-cast the projection weight once in the wrapper: halves its DMA/VMEM footprint
    # and avoids an in-kernel cast on every grid step.  (Numerics identical to casting
    # in-kernel; LN math stays in f32.)
    proj_w_bf16 = params["proj_w"].astype(jnp.bfloat16)

    in_specs = [
        pl.BlockSpec((wpb, hw, C), lambda i: (i, 0, 0)),   # windows
        pl.BlockSpec((1, C), lambda i: (0, 0)),            # ln1 gamma
        pl.BlockSpec((1, C), lambda i: (0, 0)),            # ln1 beta
        pl.BlockSpec((hw, 1), lambda i: (0, 0)),           # ln2 gamma (over hw)
        pl.BlockSpec((hw, 1), lambda i: (0, 0)),           # ln2 beta
        pl.BlockSpec((C, C), lambda i: (0, 0)),            # proj weight (in, out), bf16
        pl.BlockSpec((1, C), lambda i: (0, 0)),            # proj bias
    ]
    out_specs = pl.BlockSpec((wpb, hw, C), lambda i: (i, 0, 0))

    out_w = pl.pallas_call(
        swin_block_kernel,
        out_shape=jax.ShapeDtypeStruct((nw, hw, C), jnp.float32),
        grid_spec=pltpu.PrefetchScalarGridSpec(
            num_scalar_prefetch=0,
            grid=grid,
            in_specs=in_specs,
            out_specs=out_specs,
        ),
        compiler_params=pltpu.CompilerParams(
            dimension_semantics=("parallel",)),
    )(xw, params["ln1_g"], params["ln1_b"], params["ln2_g"], params["ln2_b"],
      proj_w_bf16, params["proj_b"])

    out = window_reverse(out_w, ws, B, H, W)
    if shift_size > 0:
        out = jnp.roll(out, shift=(shift_size, shift_size), axis=(1, 2))
    return out


# ------------------------------------------------------------------------- reference
def reference(x, params, window_size, shift_size=0):
    """Pure-JAX f32 reference of the PyTorch forward (NHWC)."""
    B, H, W, C = x.shape
    ws = window_size
    g1 = params["ln1_g"].reshape(C)
    b1 = params["ln1_b"].reshape(C)
    g2 = params["ln2_g"].reshape(ws * ws)
    b2 = params["ln2_b"].reshape(ws * ws)
    wp = params["proj_w"]                                  # (C_in, C_out)
    bp = params["proj_b"].reshape(C)

    # self.norm over channels
    mu = x.mean(-1, keepdims=True)
    var = ((x - mu) ** 2).mean(-1, keepdims=True)
    xn = (x - mu) / jnp.sqrt(var + _EPS) * g1 + b1

    xs = jnp.roll(xn, (-shift_size, -shift_size), (1, 2)) if shift_size > 0 else xn
    w = window_partition(xs, ws)                           # (NW, hw, C)

    # SpatialMLP: LN over hw (per window, per channel), then Linear(C, C)
    wt = jnp.swapaxes(w, 1, 2)                             # (NW, C, hw)
    mu2 = wt.mean(-1, keepdims=True)
    var2 = ((wt - mu2) ** 2).mean(-1, keepdims=True)
    wtn = (wt - mu2) / jnp.sqrt(var2 + _EPS) * g2 + b2
    wn = jnp.swapaxes(wtn, 1, 2)                           # (NW, hw, C)
    out_w = wn @ wp + bp

    out = window_reverse(out_w, ws, B, H, W)
    if shift_size > 0:
        out = jnp.roll(out, (shift_size, shift_size), (1, 2))
    return out


def init_params(key, dim, window_size):
    hw = window_size * window_size
    k = jax.random.split(key, 6)
    return {
        "ln1_g": 1.0 + 0.1 * jax.random.normal(k[0], (1, dim), jnp.float32),
        "ln1_b": 0.1 * jax.random.normal(k[1], (1, dim), jnp.float32),
        "ln2_g": 1.0 + 0.1 * jax.random.normal(k[2], (hw, 1), jnp.float32),
        "ln2_b": 0.1 * jax.random.normal(k[3], (hw, 1), jnp.float32),
        # stored as (in, out), i.e. transposed relative to nn.Linear's (out, in)
        "proj_w": jax.random.normal(k[4], (dim, dim), jnp.float32) / jnp.sqrt(dim),
        "proj_b": 0.05 * jax.random.normal(k[5], (1, dim), jnp.float32),
    }


if __name__ == "__main__":
    key = jax.random.PRNGKey(0)
    kp, kx = jax.random.split(key, 2)

    B, H, W, C = 2, 16, 16, 32
    window_size = 8

    params = init_params(kp, C, window_size)
    x = jax.random.normal(kx, (B, H, W, C), jnp.float32)

    # shift_size = 0 (module default) and a shifted variant
    for shift in (0, 4):
        out = swin_spatial_block(x, params, window_size, shift_size=shift)
        out = jax.block_until_ready(out)
        ref = reference(x, params, window_size, shift_size=shift)
        assert out.shape == (B, H, W, C)
        err = float(jnp.max(jnp.abs(out - ref)))
        assert jnp.allclose(out, ref, rtol=2e-2, atol=2e-2), \
            f"shift={shift}: max abs err {err}"

    print("KERNEL_OK")
</pallas_src>

<mosaic_0001>
module attributes {stable_mosaic.version = 11 : i64} {
  func.func @swin_block_kernel(%arg0: i32, %arg1: memref<4x64x32xf32, #tpu.memory_space<vmem>>, %arg2: memref<1x32xf32, #tpu.memory_space<vmem>>, %arg3: memref<1x32xf32, #tpu.memory_space<vmem>>, %arg4: memref<64x1xf32, #tpu.memory_space<vmem>>, %arg5: memref<64x1xf32, #tpu.memory_space<vmem>>, %arg6: memref<32x32xbf16, #tpu.memory_space<vmem>>, %arg7: memref<1x32xf32, #tpu.memory_space<vmem>>, %arg8: memref<4x64x32xf32, #tpu.memory_space<vmem>>) attributes {dimension_semantics = [#tpu.dimension_semantics<parallel>], iteration_bounds = array<i64: 2>, scalar_prefetch = 0 : i64, scratch_operands = 0 : i64, tpu.core_type = #tpu.core_type<tc>, window_params = [{transform_indices = @transform_0, window_bounds = array<i64: 4, 64, 32>}, {pipeline_mode = #tpu.pipeline_mode<synchronous>, transform_indices = @transform_1, window_bounds = array<i64: 1, 32>}, {pipeline_mode = #tpu.pipeline_mode<synchronous>, transform_indices = @transform_2, window_bounds = array<i64: 1, 32>}, {pipeline_mode = #tpu.pipeline_mode<synchronous>, transform_indices = @transform_3, window_bounds = array<i64: 64, 1>}, {pipeline_mode = #tpu.pipeline_mode<synchronous>, transform_indices = @transform_4, window_bounds = array<i64: 64, 1>}, {pipeline_mode = #tpu.pipeline_mode<synchronous>, transform_indices = @transform_5, window_bounds = array<i64: 32, 32>}, {pipeline_mode = #tpu.pipeline_mode<synchronous>, transform_indices = @transform_6, window_bounds = array<i64: 1, 32>}, {transform_indices = @transform_7, window_bounds = array<i64: 4, 64, 32>}]} {
    %c0 = arith.constant 0 : index
    %c0_0 = arith.constant 0 : index
    %c0_1 = arith.constant 0 : index
    %0 = vector.load %arg1[%c0, %c0_0, %c0_1] : memref<4x64x32xf32, #tpu.memory_space<vmem>>, vector<4x64x32xf32>
    %cst = arith.constant dense<0.000000e+00> : vector<4x64xf32>
    %1 = vector.multi_reduction <add>, %0, %cst [2] : vector<4x64x32xf32> to vector<4x64xf32>
    %2 = vector.shape_cast %1 : vector<4x64xf32> to vector<4x64x1xf32>
    %cst_2 = arith.constant 3.200000e+01 : f32
    %3 = vector.broadcast %cst_2 : f32 to vector<4x64x1xf32>
    %4 = arith.divf %2, %3 : vector<4x64x1xf32>
    %5 = vector.broadcast %4 : vector<4x64x1xf32> to vector<4x64x32xf32>
    %6 = arith.subf %0, %5 : vector<4x64x32xf32>
    %7 = arith.mulf %6, %6 : vector<4x64x32xf32>
    %cst_3 = arith.constant dense<0.000000e+00> : vector<4x64xf32>
    %8 = vector.multi_reduction <add>, %7, %cst_3 [2] : vector<4x64x32xf32> to vector<4x64xf32>
    %9 = vector.shape_cast %8 : vector<4x64xf32> to vector<4x64x1xf32>
    %cst_4 = arith.constant 3.200000e+01 : f32
    %10 = vector.broadcast %cst_4 : f32 to vector<4x64x1xf32>
    %11 = arith.divf %9, %10 : vector<4x64x1xf32>
    %cst_5 = arith.constant 9.99999974E-6 : f32
    %12 = vector.broadcast %cst_5 : f32 to vector<4x64x1xf32>
    %13 = arith.addf %11, %12 : vector<4x64x1xf32>
    %14 = math.rsqrt %13 : vector<4x64x1xf32>
    %15 = vector.broadcast %14 : vector<4x64x1xf32> to vector<4x64x32xf32>
    %16 = arith.mulf %6, %15 : vector<4x64x32xf32>
    %c0_6 = arith.constant 0 : index
    %c0_7 = arith.constant 0 : index
    %17 = vector.load %arg2[%c0_6, %c0_7] : memref<1x32xf32, #tpu.memory_space<vmem>>, vector<1x32xf32>
    %18 = vector.shape_cast %17 : vector<1x32xf32> to vector<1x1x32xf32>
    %19 = vector.broadcast %18 : vector<1x1x32xf32> to vector<4x64x32xf32>
    %20 = arith.mulf %16, %19 : vector<4x64x32xf32>
    %c0_8 = arith.constant 0 : index
    %c0_9 = arith.constant 0 : index
    %21 = vector.load %arg3[%c0_8, %c0_9] : memref<1x32xf32, #tpu.memory_space<vmem>>, vector<1x32xf32>
    %22 = vector.shape_cast %21 : vector<1x32xf32> to vector<1x1x32xf32>
    %23 = vector.broadcast %22 : vector<1x1x32xf32> to vector<4x64x32xf32>
    %24 = arith.addf %20, %23 : vector<4x64x32xf32>
    %cst_10 = arith.constant dense<0.000000e+00> : vector<4x32xf32>
    %25 = vector.multi_reduction <add>, %24, %cst_10 [1] : vector<4x64x32xf32> to vector<4x32xf32>
    %26 = vector.shape_cast %25 : vector<4x32xf32> to vector<4x1x32xf32>
    %cst_11 = arith.constant 6.400000e+01 : f32
    %27 = vector.broadcast %cst_11 : f32 to vector<4x1x32xf32>
    %28 = arith.divf %26, %27 : vector<4x1x32xf32>
    %29 = vector.broadcast %28 : vector<4x1x32xf32> to vector<4x64x32xf32>
    %30 = arith.subf %24, %29 : vector<4x64x32xf32>
    %31 = arith.mulf %30, %30 : vector<4x64x32xf32>
    %cst_12 = arith.constant dense<0.000000e+00> : vector<4x32xf32>
    %32 = vector.multi_reduction <add>, %31, %cst_12 [1] : vector<4x64x32xf32> to vector<4x32xf32>
    %33 = vector.shape_cast %32 : vector<4x32xf32> to vector<4x1x32xf32>
    %cst_13 = arith.constant 6.400000e+01 : f32
    %34 = vector.broadcast %cst_13 : f32 to vector<4x1x32xf32>
    %35 = arith.divf %33, %34 : vector<4x1x32xf32>
    %cst_14 = arith.constant 9.99999974E-6 : f32
    %36 = vector.broadcast %cst_14 : f32 to vector<4x1x32xf32>
    %37 = arith.addf %35, %36 : vector<4x1x32xf32>
    %38 = math.rsqrt %37 : vector<4x1x32xf32>
    %39 = vector.broadcast %38 : vector<4x1x32xf32> to vector<4x64x32xf32>
    %40 = arith.mulf %30, %39 : vector<4x64x32xf32>
    %c0_15 = arith.constant 0 : index
    %c0_16 = arith.constant 0 : index
    %41 = vector.load %arg4[%c0_15, %c0_16] : memref<64x1xf32, #tpu.memory_space<vmem>>, vector<64x1xf32>
    %42 = vector.shape_cast %41 : vector<64x1xf32> to vector<1x64x1xf32>
    %43 = vector.broadcast %42 : vector<1x64x1xf32> to vector<4x64x32xf32>
    %44 = arith.mulf %40, %43 : vector<4x64x32xf32>
    %c0_17 = arith.constant 0 : index
    %c0_18 = arith.constant 0 : index
    %45 = vector.load %arg5[%c0_17, %c0_18] : memref<64x1xf32, #tpu.memory_space<vmem>>, vector<64x1xf32>
    %46 = vector.shape_cast %45 : vector<64x1xf32> to vector<1x64x1xf32>
    %47 = vector.broadcast %46 : vector<1x64x1xf32> to vector<4x64x32xf32>
    %48 = arith.addf %44, %47 : vector<4x64x32xf32>
    %49 = vector.shape_cast %48 : vector<4x64x32xf32> to vector<256x32xf32>
    %50 = arith.truncf %49 : vector<256x32xf32> to vector<256x32xbf16>
    %c0_19 = arith.constant 0 : index
    %c0_20 = arith.constant 0 : index
    %51 = vector.load %arg6[%c0_19, %c0_20] : memref<32x32xbf16, #tpu.memory_space<vmem>>, vector<32x32xbf16>
    %cst_21 = arith.constant dense<0.000000e+00> : vector<256x32xf32>
    %52 = tpu.matmul %50, %51, %cst_21 {dimension_numbers = #tpu.dot_dimension_numbers<[1], [0], [0], [1], [0, 0, 1, 1], [], []>} : vector<256x32xbf16>, vector<32x32xbf16>, vector<256x32xf32> -> vector<256x32xf32>
    %c0_22 = arith.constant 0 : index
    %c0_23 = arith.constant 0 : index
    %53 = vector.load %arg7[%c0_22, %c0_23] : memref<1x32xf32, #tpu.memory_space<vmem>>, vector<1x32xf32>
    %54 = vector.broadcast %53 : vector<1x32xf32> to vector<256x32xf32>
    %55 = arith.addf %52, %54 : vector<256x32xf32>
    %56 = vector.shape_cast %55 : vector<256x32xf32> to vector<4x64x32xf32>
    %c0_24 = arith.constant 0 : index
    %c0_25 = arith.constant 0 : index
    %c0_26 = arith.constant 0 : index
    %57 = vector.load %arg8[%c0_24, %c0_25, %c0_26] : memref<4x64x32xf32, #tpu.memory_space<vmem>>, vector<4x64x32xf32>
    tpu.vector_store %arg8[%c0_24, %c0_25, %c0_26], %56 {strides = array<i32>} : memref<4x64x32xf32, #tpu.memory_space<vmem>>, vector<4x64x32xf32>,
    return
  }
  func.func @transform_0(%arg0: i32) -> (i32, i32, i32) {
    %c0_i32 = arith.constant 0 : i32
    %c0_i32_0 = arith.constant 0 : i32
    %c0_i32_1 = arith.constant 0 : i32
    return %arg0, %c0_i32, %c0_i32_0 : i32, i32, i32
  }
  func.func @transform_1(%arg0: i32) -> (i32, i32) {
    %c0_i32 = arith.constant 0 : i32
    %c0_i32_0 = arith.constant 0 : i32
    %c0_i32_1 = arith.constant 0 : i32
    return %c0_i32, %c0_i32_0 : i32, i32
  }
  func.func @transform_2(%arg0: i32) -> (i32, i32) {
    %c0_i32 = arith.constant 0 : i32
    %c0_i32_0 = arith.constant 0 : i32
    %c0_i32_1 = arith.constant 0 : i32
    return %c0_i32, %c0_i32_0 : i32, i32
  }
  func.func @transform_3(%arg0: i32) -> (i32, i32) {
    %c0_i32 = arith.constant 0 : i32
    %c0_i32_0 = arith.constant 0 : i32
    %c0_i32_1 = arith.constant 0 : i32
    return %c0_i32, %c0_i32_0 : i32, i32
  }
  func.func @transform_4(%arg0: i32) -> (i32, i32) {
    %c0_i32 = arith.constant 0 : i32
    %c0_i32_0 = arith.constant 0 : i32
    %c0_i32_1 = arith.constant 0 : i32
    return %c0_i32, %c0_i32_0 : i32, i32
  }
  func.func @transform_5(%arg0: i32) -> (i32, i32) {
    %c0_i32 = arith.constant 0 : i32
    %c0_i32_0 = arith.constant 0 : i32
    %c0_i32_1 = arith.constant 0 : i32
    return %c0_i32, %c0_i32_0 : i32, i32
  }
  func.func @transform_6(%arg0: i32) -> (i32, i32) {
    %c0_i32 = arith.constant 0 : i32
    %c0_i32_0 = arith.constant 0 : i32
    %c0_i32_1 = arith.constant 0 : i32
    return %c0_i32, %c0_i32_0 : i32, i32
  }
  func.func @transform_7(%arg0: i32) -> (i32, i32, i32) {
    %c0_i32 = arith.constant 0 : i32
    %c0_i32_0 = arith.constant 0 : i32
    %c0_i32_1 = arith.constant 0 : i32
    return %arg0, %c0_i32, %c0_i32_0 : i32, i32, i32
  }
}

</mosaic_0001>

<bundles_post_ra>
// kernel: tpu_custom_call.1
= control target key start
LH: loop header
LB: loop body
LE: loop exit
PB: predicated region body
PF: predicated region fallthrough
CT: control target
= control target key end

     0   :  { %s1823_s24 = smov 0   ;;  %s2968_s0 = inlined_call_operand.vmem [shape: f32[8,64,32], index: 0, kind: input, shape index: {}]   ;;  %s2969_s1 = inlined_call_operand.vmem [shape: f32[1,32], index: 1, kind: input, shape index: {}]   ;;  %s2970_s2 = inlined_call_operand.vmem [shape: f32[1,32], index: 2, kind: input, shape index: {}]   ;;  %s2971_s3 = inlined_call_operand.vmem [shape: f32[64,1], index: 3, kind: input, shape index: {}]   ;;  %s2972_s4 = inlined_call_operand.vmem [shape: f32[64,1], index: 4, kind: input, shape index: {}]   ;;  %s2973_s5 = inlined_call_operand.vmem [shape: bf16[32,32], index: 5, kind: input, shape index: {}]   ;;  %s2974_s6 = inlined_call_operand.vmem [shape: f32[1,32], index: 6, kind: input, shape index: {}]   ;;  %s2975_s7 = inlined_call_operand.vmem [shape: f32[8,64,32], index: 7, kind: output, shape index: {}]  }
   0x1 LB: > { %s1595_s25 = sadd.s32 4294967295, %s1780_s24   ;;  %p1599_p0 = scmp.ge.s32.totalorder %s1780_s24, 1  ;;  %s1780_s24 = sphi %s1823_s24, %s17_s24  }
   0x2   : > { %p239_p1 = scmp.lt.s32.totalorder %s1780_s24, 3 }
   0x4   : > { %p240_p2 = pnand %p1599_p0, %p239_p1 }
   0x5   : > { %s1600_s26 = sshll.u32 (!%p240_p2), %s1595_s25, 2 }
   0x6   : > { %243 = sbr.rel (%p240_p2) target bundleno = 688 (0x2b0), region = 48  ;;  %p274_p3 = scmp.lt.s32.totalorder (!%p240_p2), %s1600_s26, 7 }
   0xb   : > { %s2977_s26 = smov (!%p274_p3, %s1600_s26), 7  ;;  %vm320_vm0 = vcmask 261120  }
   0xc   : > { %s1629_s27 = sshll.u32 %s2977_s26, 6 }
   0xd   : > { %s1839_s30 = scalar_lea.vmem %s2968_s0, %s1629_s27  ;;  %s2867_s12 = scalar_lea.vmem %s2975_s7, %s1629_s27 }
   0xe   : > { %v1842_v0 = vld [vmem:[%s1839_s30] sm:$0xff]  ;;  %v1845_v1 = vld [vmem:[%s1839_s30 + $0x10] sm:$0xff]  ;;  %v1848_v2 = vld [vmem:[%s1839_s30 + $0x8] sm:$0xff] }
   0xf   : > { %v321_v3 = vsel %vm320_vm0, %v1842_v0, 0.0  ;;  %v327_v4 = vsel %vm320_vm0, %v1845_v1, 0.0  ;;  %v1855_v5 = vld [vmem:[%s1839_s30 + $0x80] sm:$0xff]  ;;  %v324_v6 = vsel %vm320_vm0, %v1848_v2, 0.0  ;;  %v1862_v8 = vld [vmem:[%s1839_s30 + $0x88] sm:$0xff]  ;;  %v1865_v9 = vld [vmem:[%s1839_s30 + $0x18] sm:$0xff] }
  0x10   : > { %322 = vadd.xlane.f32.xlu0 %v321_v3  ;;  %328 = vadd.xlane.f32.xlu1 %v327_v4  ;;  %v369_v7 = vsel %vm320_vm0, %v1855_v5, 0.0  ;;  %v372_v10 = vsel %vm320_vm0, %v1862_v8, 0.0  ;;  %v330_v11 = vsel %vm320_vm0, %v1865_v9, 0.0  ;;  %v1872_v12 = vld [vmem:[%s1839_s30 + $0x90] sm:$0xff]  ;;  %v1875_v13 = vld [vmem:[%s1839_s30 + $0x20] sm:$0xff]  ;;  %v1882_v16 = vld [vmem:[%s1839_s30 + $0x98] sm:$0xff] }
  0x11   : > { %v375_v14 = vsel %vm320_vm0, %v1872_v12, 0.0  ;;  %v333_v15 = vsel %vm320_vm0, %v1875_v13, 0.0  ;;  %v1885_v17 = vld [vmem:[%s1839_s30 + $0x28] sm:$0xff]  ;;  %v378_v18 = vsel %vm320_vm0, %v1882_v16, 0.0  ;;  %v1892_v20 = vld [vmem:[%s1839_s30 + $0xa0] sm:$0xff]  ;;  %v1895_v21 = vld [vmem:[%s1839_s30 + $0x30] sm:$0xff] }
  0x12   : > { %v336_v19 = vsel %vm320_vm0, %v1885_v17, 0.0  ;;  %v381_v22 = vsel %vm320_vm0, %v1892_v20, 0.0  ;;  %v339_v23 = vsel %vm320_vm0, %v1895_v21, 0.0  ;;  %v1902_v24 = vld [vmem:[%s1839_s30 + $0xa8] sm:$0xff]  ;;  %v1905_v25 = vld [vmem:[%s1839_s30 + $0x38] sm:$0xff]  ;;  %v1912_v28 = vld [vmem:[%s1839_s30 + $0xb0] sm:$0xff] }
  0x13   : > { %v384_v26 = vsel %vm320_vm0, %v1902_v24, 0.0  ;;  %v342_v27 = vsel %vm320_vm0, %v1905_v25, 0.0  ;;  %v1915_v29 = vld [vmem:[%s1839_s30 + $0xb8] sm:$0xff]  ;;  %v387_v30 = vsel %vm320_vm0, %v1912_v28, 0.0  ;;  %v1922_v32 = vld [vmem:[%s1839_s30 + $0x40] sm:$0xff]  ;;  %v1925_v33 = vld [vmem:[%s1839_s30 + $0x48] sm:$0xff] }
  0x14   : > { %325 = vadd.xlane.f32.xlu0 %v324_v6  ;;  %370 = vadd.xlane.f32.xlu1 %v369_v7  ;;  %v390_v31 = vsel %vm320_vm0, %v1915_v29, 0.0  ;;  %v345_v34 = vsel %vm320_vm0, %v1922_v32, 0.0  ;;  %v348_v35 = vsel %vm320_vm0, %v1925_v33, 0.0  ;;  %v1932_v36 = vld [vmem:[%s1839_s30 + $0x50] sm:$0xff]  ;;  %v1935_v37 = vld [vmem:[%s1839_s30 + $0xc0] sm:$0xff]  ;;  %v1942_v40 = vld [vmem:[%s1839_s30 + $0xc8] sm:$0xff] }
  0x15   : > { %v351_v38 = vsel %vm320_vm0, %v1932_v36, 0.0  ;;  %v393_v39 = vsel %vm320_vm0, %v1935_v37, 0.0  ;;  %v1945_v41 = vld [vmem:[%s1839_s30 + $0x58] sm:$0xff]  ;;  %v396_v42 = vsel %vm320_vm0, %v1942_v40, 0.0  ;;  %v1952_v44 = vld [vmem:[%s1839_s30 + $0xd0] sm:$0xff]  ;;  %v1955_v45 = vld [vmem:[%s1839_s30 + $0x60] sm:$0xff] }
  0x16   : > { %v354_v43 = vsel %vm320_vm0, %v1945_v41, 0.0  ;;  %v399_v46 = vsel %vm320_vm0, %v1952_v44, 0.0  ;;  %v357_v47 = vsel %vm320_vm0, %v1955_v45, 0.0  ;;  %v1962_v48 = vld [vmem:[%s1839_s30 + $0xd8] sm:$0xff]  ;;  %v1965_v49 = vld [vmem:[%s1839_s30 + $0x68] sm:$0xff]  ;;  %v1972_v52 = vld [vmem:[%s1839_s30 + $0xe0] sm:$0xff] }
  0x17   : > { %v402_v50 = vsel %vm320_vm0, %v1962_v48, 0.0  ;;  %v360_v51 = vsel %vm320_vm0, %v1965_v49, 0.0  ;;  %v1975_v53 = vld [vmem:[%s1839_s30 + $0x70] sm:$0xff]  ;;  %v405_v54 = vsel %vm320_vm0, %v1972_v52, 0.0  ;;  %v1982_v56 = vld [vmem:[%s1839_s30 + $0xe8] sm:$0xff]  ;;  %v1985_v57 = vld [vmem:[%s1839_s30 + $0x78] sm:$0xff] }
  0x18   : > { %373 = vadd.xlane.f32.xlu0 %v372_v10  ;;  %331 = vadd.xlane.f32.xlu1 %v330_v11  ;;  %v363_v55 = vsel %vm320_vm0, %v1975_v53, 0.0  ;;  %v408_v58 = vsel %vm320_vm0, %v1982_v56, 0.0  ;;  %v366_v59 = vsel %vm320_vm0, %v1985_v57, 0.0  ;;  %v1992_v60 = vld [vmem:[%s1839_s30 + $0xf0] sm:$0xff]  ;;  %v1995_v61 = vld [vmem:[%s1839_s30 + $0xf8] sm:$0xff]  ;;  %v1782_v3 = vmov 0  }
  0x19   : > { %v411_v62 = vsel %vm320_vm0, %v1992_v60, 0.0  ;;  %v414_v63 = vsel %vm320_vm0, %v1995_v61, 0.0  ;;  %1699 = vset.pattern.permute.xlu1 %v1782_v3  ;;  %1698 = vset.pattern.permute.xlu0 %v1782_v3 }
  0x1c   : > { %376 = vadd.xlane.f32.xlu0 %v375_v14  ;;  %334 = vadd.xlane.f32.xlu1 %v333_v15 }
  0x20   : > { %379 = vadd.xlane.f32.xlu0 %v378_v18  ;;  %337 = vadd.xlane.f32.xlu1 %v336_v19 }
  0x24   : > { %382 = vadd.xlane.f32.xlu0 %v381_v22  ;;  %340 = vadd.xlane.f32.xlu1 %v339_v23 }
  0x28   : > { %385 = vadd.xlane.f32.xlu0 %v384_v26  ;;  %343 = vadd.xlane.f32.xlu1 %v342_v27 }
  0x2c   : > { %388 = vadd.xlane.f32.xlu0 %v387_v30  ;;  %391 = vadd.xlane.f32.xlu1 %v390_v31 }
  0x30   : > { %346 = vadd.xlane.f32.xlu0 %v345_v34  ;;  %349 = vadd.xlane.f32.xlu1 %v348_v35 }
  0x34   : > { %352 = vadd.xlane.f32.xlu0 %v351_v38  ;;  %394 = vadd.xlane.f32.xlu1 %v393_v39 }
  0x38   : > { %397 = vadd.xlane.f32.xlu0 %v396_v42  ;;  %355 = vadd.xlane.f32.xlu1 %v354_v43 }
  0x3c   : > { %400 = vadd.xlane.f32.xlu0 %v399_v46  ;;  %358 = vadd.xlane.f32.xlu1 %v357_v47 }
  0x40   : > { %403 = vadd.xlane.f32.xlu0 %v402_v50  ;;  %361 = vadd.xlane.f32.xlu1 %v360_v51 }
  0x44   : > { %406 = vadd.xlane.f32.xlu0 %v405_v54  ;;  %364 = vadd.xlane.f32.xlu1 %v363_v55 }
  0x48   : > { %409 = vadd.xlane.f32.xlu0 %v408_v58  ;;  %367 = vadd.xlane.f32.xlu1 %v366_v59 }
  0x4c   : > { %412 = vadd.xlane.f32.xlu0 %v411_v62  ;;  %415 = vadd.xlane.f32.xlu1 %v414_v63 }
  0x99   : > { %v323_v4 = vpop.xlane.xlu0 %322  ;;  %v329_v6 = vpop.xlane.xlu1 %328 }
  0x9a   : > { %v418_v7 = vmul.f32 0.03125, %v323_v4  ;;  %v420_v10 = vmul.f32 0.03125, %v329_v6 }
  0x9c   : > { %v2002_v11 = vsub.f32 %v1842_v0, %v418_v7  ;;  %v2005_v14 = vsub.f32 %v1845_v1, %v420_v10 }
  0x9d   : > { %v326_v15 = vpop.xlane.xlu0 %325  ;;  %v371_v18 = vpop.xlane.xlu1 %370 }
  0x9e   : > { %v419_v19 = vmul.f32 0.03125, %v326_v15  ;;  %v434_v22 = vmul.f32 0.03125, %v371_v18  ;;  %v482_v23 = vmul.f32 %v2002_v11, %v2002_v11  ;;  %v484_v26 = vmul.f32 %v2005_v14, %v2005_v14 }
  0xa0   : > { %v2012_v27 = vsub.f32 %v1848_v2, %v419_v19  ;;  %v2015_v30 = vsub.f32 %v1855_v5, %v434_v22  ;;  %v514_v0 = vsel %vm320_vm0, %v482_v23, 0.0  ;;  %v520_v34 = vsel %vm320_vm0, %v484_v26, 0.0 }
  0xa1   : > { %515 = vadd.xlane.f32.xlu0 %v514_v0  ;;  %v374_v1 = vpop.xlane.xlu0 %373  ;;  %v332_v31 = vpop.xlane.xlu1 %331 }
  0xa2   : > { %v435_v35 = vmul.f32 0.03125, %v374_v1  ;;  %v421_v38 = vmul.f32 0.03125, %v332_v31  ;;  %v483_v39 = vmul.f32 %v2012_v27, %v2012_v27  ;;  %v498_v42 = vmul.f32 %v2015_v30, %v2015_v30 }
  0xa4   : > { %v2024_v2 = vsub.f32 %v1862_v8, %v435_v35  ;;  %v2027_v5 = vsub.f32 %v1865_v9, %v421_v38  ;;  %v517_v43 = vsel %vm320_vm0, %v483_v39, 0.0  ;;  %v562_v50 = vsel %vm320_vm0, %v498_v42, 0.0 }
  0xa5   : > { %521 = vadd.xlane.f32.xlu0 %v520_v34  ;;  %518 = vadd.xlane.f32.xlu1 %v517_v43  ;;  %v377_v46 = vpop.xlane.xlu0 %376  ;;  %v335_v47 = vpop.xlane.xlu1 %334 }
  0xa6   : > { %v436_v51 = vmul.f32 0.03125, %v377_v46  ;;  %v422_v54 = vmul.f32 0.03125, %v335_v47  ;;  %v499_v55 = vmul.f32 %v2024_v2, %v2024_v2  ;;  %v485_v8 = vmul.f32 %v2027_v5, %v2027_v5 }
  0xa8   : > { %v2036_v58 = vsub.f32 %v1872_v12, %v436_v51  ;;  %v2039_v9 = vsub.f32 %v1875_v13, %v422_v54  ;;  %v565_v59 = vsel %vm320_vm0, %v499_v55, 0.0  ;;  %v523_v3 = vsel %vm320_vm0, %v485_v8, 0.0 }
  0xa9   : > { %563 = vadd.xlane.f32.xlu1 %v562_v50  ;;  %566 = vadd.xlane.f32.xlu0 %v565_v59  ;;  %v380_v62 = vpop.xlane.xlu0 %379  ;;  %v338_v63 = vpop.xlane.xlu1 %337 }
  0xaa   : > { %v437_v4 = vmul.f32 0.03125, %v380_v62  ;;  %v423_v6 = vmul.f32 0.03125, %v338_v63  ;;  %v500_v7 = vmul.f32 %v2036_v58, %v2036_v58  ;;  %v486_v12 = vmul.f32 %v2039_v9, %v2039_v9 }
  0xac   : > { %v2048_v10 = vsub.f32 %v1882_v16, %v437_v4  ;;  %v2051_v13 = vsub.f32 %v1885_v17, %v423_v6  ;;  %v568_v15 = vsel %vm320_vm0, %v500_v7, 0.0  ;;  %v526_v22 = vsel %vm320_vm0, %v486_v12, 0.0 }
  0xad   : > { %524 = vadd.xlane.f32.xlu1 %v523_v3  ;;  %569 = vadd.xlane.f32.xlu0 %v568_v15  ;;  %v383_v18 = vpop.xlane.xlu0 %382  ;;  %v341_v19 = vpop.xlane.xlu1 %340 }
  0xae   : > { %v438_v23 = vmul.f32 0.03125, %v383_v18  ;;  %v424_v26 = vmul.f32 0.03125, %v341_v19  ;;  %v501_v0 = vmul.f32 %v2048_v10, %v2048_v10  ;;  %v487_v16 = vmul.f32 %v2051_v13, %v2051_v13 }
  0xb0   : > { %v2060_v1 = vsub.f32 %v1892_v20, %v438_v23  ;;  %v2063_v17 = vsub.f32 %v1895_v21, %v424_v26  ;;  %v571_v31 = vsel %vm320_vm0, %v501_v0, 0.0  ;;  %v529_v38 = vsel %vm320_vm0, %v487_v16, 0.0 }
  0xb1   : > { %527 = vadd.xlane.f32.xlu1 %v526_v22  ;;  %572 = vadd.xlane.f32.xlu0 %v571_v31  ;;  %v386_v34 = vpop.xlane.xlu0 %385  ;;  %v344_v35 = vpop.xlane.xlu1 %343 }
  0xb2   : > { %v439_v39 = vmul.f32 0.03125, %v386_v34  ;;  %v425_v42 = vmul.f32 0.03125, %v344_v35  ;;  %v502_v43 = vmul.f32 %v2060_v1, %v2060_v1  ;;  %v488_v20 = vmul.f32 %v2063_v17, %v2063_v17 }
  0xb4   : > { %v2072_v46 = vsub.f32 %v1902_v24, %v439_v39  ;;  %v2075_v21 = vsub.f32 %v1905_v25, %v425_v42  ;;  %v574_v47 = vsel %vm320_vm0, %v502_v43, 0.0  ;;  %v532_v54 = vsel %vm320_vm0, %v488_v20, 0.0 }
  0xb5   : > { %530 = vadd.xlane.f32.xlu1 %v529_v38  ;;  %575 = vadd.xlane.f32.xlu0 %v574_v47  ;;  %v389_v50 = vpop.xlane.xlu0 %388  ;;  %v392_v51 = vpop.xlane.xlu1 %391 }
  0xb6   : > { %v440_v55 = vmul.f32 0.03125, %v389_v50  ;;  %v441_v8 = vmul.f32 0.03125, %v392_v51  ;;  %v503_v59 = vmul.f32 %v2072_v46, %v2072_v46  ;;  %v489_v24 = vmul.f32 %v2075_v21, %v2075_v21 }
  0xb8   : > { %v2084_v62 = vsub.f32 %v1912_v28, %v440_v55  ;;  %v2087_v25 = vsub.f32 %v1915_v29, %v441_v8  ;;  %v577_v63 = vsel %vm320_vm0, %v503_v59, 0.0  ;;  %v535_v6 = vsel %vm320_vm0, %v489_v24, 0.0 }
  0xb9   : > { %533 = vadd.xlane.f32.xlu1 %v532_v54  ;;  %578 = vadd.xlane.f32.xlu0 %v577_v63  ;;  %v347_v3 = vpop.xlane.xlu0 %346  ;;  %v350_v4 = vpop.xlane.xlu1 %349 }
  0xba   : > { %v426_v7 = vmul.f32 0.03125, %v347_v3  ;;  %v427_v12 = vmul.f32 0.03125, %v350_v4  ;;  %v504_v15 = vmul.f32 %v2084_v62, %v2084_v62  ;;  %v505_v28 = vmul.f32 %v2087_v25, %v2087_v25 }
  0xbc   : > { %v2096_v18 = vsub.f32 %v1922_v32, %v426_v7  ;;  %v2099_v29 = vsub.f32 %v1925_v33, %v427_v12  ;;  %v580_v19 = vsel %vm320_vm0, %v504_v15, 0.0  ;;  %v583_v26 = vsel %vm320_vm0, %v505_v28, 0.0 }
  0xbd   : > { %536 = vadd.xlane.f32.xlu1 %v535_v6  ;;  %581 = vadd.xlane.f32.xlu0 %v580_v19  ;;  %v353_v22 = vpop.xlane.xlu0 %352  ;;  %v395_v23 = vpop.xlane.xlu1 %394 }
  0xbe   : > { %v428_v0 = vmul.f32 0.03125, %v353_v22  ;;  %v442_v16 = vmul.f32 0.03125, %v395_v23  ;;  %v490_v31 = vmul.f32 %v2096_v18, %v2096_v18  ;;  %v491_v32 = vmul.f32 %v2099_v29, %v2099_v29 }
  0xc0   : > { %v2108_v34 = vsub.f32 %v1932_v36, %v428_v0  ;;  %v2111_v33 = vsub.f32 %v1935_v37, %v442_v16  ;;  %v538_v35 = vsel %vm320_vm0, %v490_v31, 0.0  ;;  %v541_v42 = vsel %vm320_vm0, %v491_v32, 0.0 }
  0xc1   : > { %584 = vadd.xlane.f32.xlu1 %v583_v26  ;;  %539 = vadd.xlane.f32.xlu0 %v538_v35  ;;  %v398_v38 = vpop.xlane.xlu0 %397  ;;  %v356_v39 = vpop.xlane.xlu1 %355 }
  0xc2   : > { %v443_v43 = vmul.f32 0.03125, %v398_v38  ;;  %v429_v20 = vmul.f32 0.03125, %v356_v39  ;;  %v492_v47 = vmul.f32 %v2108_v34, %v2108_v34  ;;  %v506_v36 = vmul.f32 %v2111_v33, %v2111_v33 }
  0xc4   : > { %v2120_v50 = vsub.f32 %v1942_v40, %v443_v43  ;;  %v2123_v37 = vsub.f32 %v1945_v41, %v429_v20  ;;  %v544_v51 = vsel %vm320_vm0, %v492_v47, 0.0  ;;  %v586_v8 = vsel %vm320_vm0, %v506_v36, 0.0 }
  0xc5   : > { %542 = vadd.xlane.f32.xlu1 %v541_v42  ;;  %545 = vadd.xlane.f32.xlu0 %v544_v51  ;;  %v401_v54 = vpop.xlane.xlu0 %400  ;;  %v359_v55 = vpop.xlane.xlu1 %358 }
  0xc6   : > { %v444_v59 = vmul.f32 0.03125, %v401_v54  ;;  %v430_v24 = vmul.f32 0.03125, %v359_v55  ;;  %v507_v63 = vmul.f32 %v2120_v50, %v2120_v50  ;;  %v493_v40 = vmul.f32 %v2123_v37, %v2123_v37 }
  0xc8   : > { %v2132_v3 = vsub.f32 %v1952_v44, %v444_v59  ;;  %v2135_v41 = vsub.f32 %v1955_v45, %v430_v24  ;;  %v589_v4 = vsel %vm320_vm0, %v507_v63, 0.0  ;;  %v547_v12 = vsel %vm320_vm0, %v493_v40, 0.0 }
  0xc9   : > { %587 = vadd.xlane.f32.xlu1 %v586_v8  ;;  %590 = vadd.xlane.f32.xlu0 %v589_v4  ;;  %v404_v6 = vpop.xlane.xlu0 %403  ;;  %v362_v7 = vpop.xlane.xlu1 %361 }
  0xca   : > { %v445_v15 = vmul.f32 0.03125, %v404_v6  ;;  %v431_v28 = vmul.f32 0.03125, %v362_v7  ;;  %v508_v19 = vmul.f32 %v2132_v3, %v2132_v3  ;;  %v494_v44 = vmul.f32 %v2135_v41, %v2135_v41 }
  0xcc   : > { %v2144_v22 = vsub.f32 %v1962_v48, %v445_v15  ;;  %v2147_v45 = vsub.f32 %v1965_v49, %v431_v28  ;;  %v592_v23 = vsel %vm320_vm0, %v508_v19, 0.0  ;;  %v550_v16 = vsel %vm320_vm0, %v494_v44, 0.0  ;;  %v1097_v44 = vld [vmem:[%s2971_s3] sm:$0xff] }
  0xcd   : > { %548 = vadd.xlane.f32.xlu1 %v547_v12  ;;  %593 = vadd.xlane.f32.xlu0 %v592_v23  ;;  %v407_v26 = vpop.xlane.xlu0 %406  ;;  %v365_v0 = vpop.xlane.xlu1 %364  ;;  %v1099_v23 = vld [vmem:[%s2971_s3 + $0x10] sm:$0xff] }
  0xce   : > { %v446_v31 = vmul.f32 0.03125, %v407_v26  ;;  %v432_v32 = vmul.f32 0.03125, %v365_v0  ;;  %v509_v35 = vmul.f32 %v2144_v22, %v2144_v22  ;;  %v495_v48 = vmul.f32 %v2147_v45, %v2147_v45  ;;  %v1102_v26 = vld [vmem:[%s2971_s3 + $0x28] sm:$0xff]  ;;  %v1100_v0 = vld [vmem:[%s2971_s3 + $0x18] sm:$0xff] }
  0xd0   : > { %v2156_v38 = vsub.f32 %v1972_v52, %v446_v31  ;;  %v2159_v49 = vsub.f32 %v1975_v53, %v432_v32  ;;  %v595_v39 = vsel %vm320_vm0, %v509_v35, 0.0  ;;  %v553_v20 = vsel %vm320_vm0, %v495_v48, 0.0  ;;  %v1177_v31 = vld [vmem:[%s2972_s4] sm:$0xff]  ;;  %v1182_v32 = vld [vmem:[%s2972_s4 + $0x28] sm:$0xff]  ;;  %v1184_v48 = vld [vmem:[%s2972_s4 + $0x38] sm:$0xff] }
  0xd1   : > { %551 = vadd.xlane.f32.xlu1 %v550_v16  ;;  %596 = vadd.xlane.f32.xlu0 %v595_v39  ;;  %v410_v42 = vpop.xlane.xlu0 %409  ;;  %v368_v43 = vpop.xlane.xlu1 %367  ;;  %v1104_v16 = vld [vmem:[%s2971_s3 + $0x38] sm:$0xff]  ;;  %v1178_v35 = vld [vmem:[%s2972_s4 + $0x8] sm:$0xff]  ;;  %v1179_v39 = vld [vmem:[%s2972_s4 + $0x10] sm:$0xff] }
  0xd2   : > { %v447_v47 = vmul.f32 0.03125, %v410_v42  ;;  %v433_v36 = vmul.f32 0.03125, %v368_v43  ;;  %v510_v51 = vmul.f32 %v2156_v38, %v2156_v38  ;;  %v496_v52 = vmul.f32 %v2159_v49, %v2159_v49  ;;  %v1180_v42 = vld [vmem:[%s2972_s4 + $0x18] sm:$0xff]  ;;  %v1101_v43 = vld [vmem:[%s2971_s3 + $0x20] sm:$0xff] }
  0xd4   : > { %v2168_v54 = vsub.f32 %v1982_v56, %v447_v47  ;;  %v2171_v53 = vsub.f32 %v1985_v57, %v433_v36  ;;  %v598_v55 = vsel %vm320_vm0, %v510_v51, 0.0  ;;  %v556_v24 = vsel %vm320_vm0, %v496_v52, 0.0  ;;  %v1181_v47 = vld [vmem:[%s2972_s4 + $0x20] sm:$0xff]  ;;  %v1183_v36 = vld [vmem:[%s2972_s4 + $0x30] sm:$0xff] }
  0xd5   : > { %554 = vadd.xlane.f32.xlu1 %v553_v20  ;;  %599 = vadd.xlane.f32.xlu0 %v598_v55  ;;  %v413_v8 = vpop.xlane.xlu0 %412  ;;  %v416_v59 = vpop.xlane.xlu1 %415  ;;  %v1103_v20 = vld [vmem:[%s2971_s3 + $0x30] sm:$0xff] }
  0xd6   : > { %v448_v63 = vmul.f32 0.03125, %v413_v8  ;;  %v449_v40 = vmul.f32 0.03125, %v416_v59  ;;  %v511_v4 = vmul.f32 %v2168_v54, %v2168_v54  ;;  %v497_v56 = vmul.f32 %v2171_v53, %v2171_v53 }
  0xd8   : > { %v2180_v6 = vsub.f32 %v1992_v60, %v448_v63  ;;  %v2183_v57 = vsub.f32 %v1995_v61, %v449_v40  ;;  %v601_v7 = vsel %vm320_vm0, %v511_v4, 0.0  ;;  %v559_v12 = vsel %vm320_vm0, %v497_v56, 0.0  ;;  %v1098_v61 = vld [vmem:[%s2971_s3 + $0x8] sm:$0xff] }
  0xd9   : > { %557 = vadd.xlane.f32.xlu1 %v556_v24  ;;  %602 = vadd.xlane.f32.xlu0 %v601_v7 }
  0xda   : > { %v512_v15 = vmul.f32 %v2180_v6, %v2180_v6  ;;  %v513_v28 = vmul.f32 %v2183_v57, %v2183_v57 }
  0xdc   : > { %v604_v19 = vsel %vm320_vm0, %v512_v15, 0.0  ;;  %v607_v60 = vsel %vm320_vm0, %v513_v28, 0.0 }
  0xdd   : > { %560 = vadd.xlane.f32.xlu1 %v559_v12  ;;  %605 = vadd.xlane.f32.xlu0 %v604_v19 }
  0xe1   : > { %608 = vadd.xlane.f32.xlu1 %v607_v60 }
  0xf2   : > { %1112 = vperm.xlu1 %1699, %v1098_v61  }
  0xf3   : > { %1107 = vperm.xlu0 %1698, %v1097_v44  }
  0xf6   : > { %1117 = vperm.xlu1 %1699, %v1099_v23  }
  0xf7   : > { %1132 = vperm.xlu0 %1698, %v1102_v26  }
  0xfa   : > { %1122 = vperm.xlu1 %1699, %v1100_v0  }
  0xfb   : > { %1142 = vperm.xlu0 %1698, %v1104_v16  }
  0xfe   : > { %1187 = vperm.xlu1 %1699, %v1177_v31  }
  0xff   : > { %1212 = vperm.xlu0 %1698, %v1182_v32  }
 0x102   : > { %1192 = vperm.xlu1 %1699, %v1178_v35  }
 0x103   : > { %1222 = vperm.xlu0 %1698, %v1184_v48  }
 0x106   : > { %1197 = vperm.xlu1 %1699, %v1179_v39  }
 0x10a   : > { %1202 = vperm.xlu1 %1699, %v1180_v42  }
 0x10e   : > { %1127 = vperm.xlu1 %1699, %v1101_v43  }
 0x112   : > { %1137 = vperm.xlu1 %1699, %v1103_v20  }
 0x116   : > { %1207 = vperm.xlu1 %1699, %v1181_v47  }
 0x11a   : > { %1217 = vperm.xlu1 %1699, %v1183_v36   ;;  %v2245_v36 = vld [vmem:[%s2969_s1] ss:$0 sm:$0xff] }
 0x12a   : > { %v516_v51 = vpop.xlane.xlu0 %515 }
 0x12b   : > { %v610_v52 = vmul.f32 0.03125, %v516_v51 }
 0x12d   : > { %v642_v55 = vadd.f32 1e-05, %v610_v52 }
 0x12e   : > { %v519_v8 = vpop.xlane.xlu1 %518  ;;  %v522_v59 = vpop.xlane.xlu0 %521 }
 0x12f   : > { %1702 = vrsqrt.f32 %v642_v55  ;;  %v611_v24 = vmul.f32 0.03125, %v519_v8  ;;  %v612_v63 = vmul.f32 0.03125, %v522_v59 }
 0x131   : > { %v643_v40 = vadd.f32 1e-05, %v611_v24  ;;  %v644_v4 = vadd.f32 1e-05, %v612_v63 }
 0x132   : > { %v564_v56 = vpop.xlane.xlu1 %563  ;;  %v567_v7 = vpop.xlane.xlu0 %566 }
 0x133   : > { %1704 = vrsqrt.f32 %v643_v40  ;;  %v626_v12 = vmul.f32 0.03125, %v564_v56  ;;  %v627_v15 = vmul.f32 0.03125, %v567_v7  ;;  %v2253_v7 = vld [vmem:[%s2970_s2] ss:$0 sm:$0xff] }
 0x134   : > { %1706 = vrsqrt.f32 %v644_v4 }
 0x135   : > { %v658_v28 = vadd.f32 1e-05, %v626_v12  ;;  %v659_v19 = vadd.f32 1e-05, %v627_v15 }
 0x136   : > { %v525_v60 = vpop.xlane.xlu1 %524  ;;  %v570_v61 = vpop.xlane.xlu0 %569 }
 0x137   : > { %1708 = vrsqrt.f32 %v658_v28  ;;  %v613_v44 = vmul.f32 0.03125, %v525_v60  ;;  %v628_v23 = vmul.f32 0.03125, %v570_v61 }
 0x138   : > { %1710 = vrsqrt.f32 %v659_v19 }
 0x139   : > { %v645_v26 = vadd.f32 1e-05, %v613_v44  ;;  %v660_v0 = vadd.f32 1e-05, %v628_v23 }
 0x13a   : > { %v528_v16 = vpop.xlane.xlu1 %527  ;;  %v573_v31 = vpop.xlane.xlu0 %572 }
 0x13b   : > { %1712 = vrsqrt.f32 %v645_v26  ;;  %v614_v32 = vmul.f32 0.03125, %v528_v16  ;;  %v629_v35 = vmul.f32 0.03125, %v573_v31  ;;  %v1700_v26 = vld [vmem:[%s2973_s5 + $0x8] sm:$0xff]  }
 0x13c   : > { %v1703_v48 = vpop.eup %1702  ;;  %1714 = vrsqrt.f32 %v660_v0  ;;  %1649 = vmatprep.subr.bf16.mxu0 %v1700_v26  ;;  %1685 = vmatprep.subr.bf16.mxu1 %v1700_v26 }
 0x13d   : > { %v646_v39 = vadd.f32 1e-05, %v614_v32  ;;  %v661_v42 = vadd.f32 1e-05, %v629_v35  ;;  %v706_v43 = vmul.f32 %v1703_v48, %v2002_v11  ;;  %1650 = vmatpush3.bf16.msra.mxu0 %v1700_v26  ;;  %1687 = vmatpush3.bf16.msra.mxu1 %v1700_v26 }
 0x13e   : > { %v531_v20 = vpop.xlane.xlu1 %530  ;;  %v576_v47 = vpop.xlane.xlu0 %575 }
 0x13f   : > { %1716 = vrsqrt.f32 %v646_v39  ;;  %v615_v51 = vmul.f32 0.03125, %v531_v20  ;;  %v630_v52 = vmul.f32 0.03125, %v576_v47  ;;  %v745_v40 = vmul.f32 %v2245_v36, %v706_v43 }
 0x140   : > { %v1705_v55 = vpop.eup %1704  ;;  %1718 = vrsqrt.f32 %v661_v42 }
 0x141   : > { %v1707_v8 = vpop.eup %1706  ;;  %v707_v59 = vmul.f32 %v1705_v55, %v2012_v27  ;;  %v647_v24 = vadd.f32 1e-05, %v615_v51  ;;  %v662_v63 = vadd.f32 1e-05, %v630_v52  ;;  %v2265_v0 = vadd.f32 %v2253_v7, %v745_v40 }
 0x142   : > { %v708_v11 = vmul.f32 %v1707_v8, %v2005_v14  ;;  %v534_v4 = vpop.xlane.xlu1 %533  ;;  %v579_v56 = vpop.xlane.xlu0 %578 }
 0x143   : > { %v746_v12 = vmul.f32 %v2245_v36, %v707_v59  ;;  %1720 = vrsqrt.f32 %v647_v24  ;;  %v616_v15 = vmul.f32 0.03125, %v534_v4  ;;  %v631_v28 = vmul.f32 0.03125, %v579_v56 }
 0x144   : > { %v1709_v19 = vpop.eup %1708  ;;  %1722 = vrsqrt.f32 %v662_v63  ;;  %v747_v27 = vmul.f32 %v2245_v36, %v708_v11  ;;  %v816_v59 = vsel %vm320_vm0, %v2265_v0, 0.0 }
 0x145   : > { %v1711_v60 = vpop.eup %1710  ;;  %v2258_v61 = vadd.f32 %v2253_v7, %v746_v12  ;;  %v722_v14 = vmul.f32 %v1709_v19, %v2015_v30  ;;  %v648_v44 = vadd.f32 1e-05, %v616_v15  ;;  %v663_v23 = vadd.f32 1e-05, %v631_v28 }
 0x146   : > { %v723_v16 = vmul.f32 %v1711_v60, %v2024_v2  ;;  %v537_v31 = vpop.xlane.xlu1 %536  ;;  %v582_v32 = vpop.xlane.xlu0 %581  ;;  %v2273_v43 = vadd.f32 %v2253_v7, %v747_v27 }
 0x147   : > { %v761_v35 = vmul.f32 %v2245_v36, %v722_v14  ;;  %1724 = vrsqrt.f32 %v648_v44  ;;  %v617_v48 = vmul.f32 0.03125, %v537_v31  ;;  %v817_v42 = vsel %vm320_vm0, %v2258_v61, 0.0 }
 0x148   : > { %v1713_v30 = vpop.eup %1712  ;;  %v762_v39 = vmul.f32 %v2245_v36, %v723_v16  ;;  %1726 = vrsqrt.f32 %v663_v23  ;;  %v632_v52 = vmul.f32 0.03125, %v582_v32  ;;  %v818_v11 = vadd.f32 %v817_v42, %v816_v59 }
 0x149   : > { %v1715_v2 = vpop.eup %1714  ;;  %v2276_v20 = vadd.f32 %v2253_v7, %v761_v35  ;;  %v709_v47 = vmul.f32 %v1713_v30, %v2027_v5  ;;  %v649_v51 = vadd.f32 1e-05, %v617_v48  ;;  %v819_v5 = vsel %vm320_vm0, %v2273_v43, 0.0 }
 0x14a   : > { %v2280_v55 = vadd.f32 %v2253_v7, %v762_v39  ;;  %v724_v8 = vmul.f32 %v1715_v2, %v2036_v58  ;;  %v585_v24 = vpop.xlane.xlu1 %584  ;;  %v540_v63 = vpop.xlane.xlu0 %539  ;;  %v664_v4 = vadd.f32 1e-05, %v632_v52  ;;  %v820_v35 = vadd.f32 %v819_v5, %v818_v11 }
 0x14b   : > { %v748_v40 = vmul.f32 %v2245_v36, %v709_v47  ;;  %1728 = vrsqrt.f32 %v649_v51  ;;  %v858_v12 = vsel %vm320_vm0, %v2276_v20, 0.0  ;;  %v633_v15 = vmul.f32 0.03125, %v585_v24 }
 0x14c   : > { %v1717_v56 = vpop.eup %1716  ;;  %v763_v58 = vmul.f32 %v2245_v36, %v724_v8  ;;  %1730 = vrsqrt.f32 %v664_v4  ;;  %v859_v60 = vsel %vm320_vm0, %v2280_v55, 0.0  ;;  %v618_v26 = vmul.f32 0.03125, %v540_v63  ;;  %v1701_v4 = vld [vmem:[%s2973_s5] sm:$0xff]  }
 0x14d   : > { %v1719_v28 = vpop.eup %1718  ;;  %v2292_v19 = vadd.f32 %v2253_v7, %v748_v40  ;;  %v710_v27 = vmul.f32 %v1717_v56, %v2039_v9  ;;  %v665_v44 = vadd.f32 1e-05, %v633_v15  ;;  %v860_v51 = vadd.f32 %v859_v60, %v858_v12  ;;  %1651 = vmatprep.subr.bf16.mxu0 %v1701_v4  ;;  %1686 = vmatprep.subr.bf16.mxu1 %v1701_v4 }
 0x14e   : > { %v725_v14 = vmul.f32 %v1719_v28, %v2048_v10  ;;  %v2299_v23 = vadd.f32 %v2253_v7, %v763_v58  ;;  %v543_v16 = vpop.xlane.xlu1 %542  ;;  %v546_v31 = vpop.xlane.xlu0 %545  ;;  %v650_v24 = vadd.f32 1e-05, %v618_v26  ;;  %1652 = vmatpush3.bf16.msra.mxu0 %v1701_v4  ;;  %1688 = vmatpush3.bf16.msra.mxu1 %v1701_v4 }
 0x14f   : > { %v749_v32 = vmul.f32 %v2245_v36, %v710_v27  ;;  %v619_v48 = vmul.f32 0.03125, %v543_v16  ;;  %v821_v39 = vsel %vm320_vm0, %v2292_v19, 0.0  ;;  %1732 = vrsqrt.f32 %v665_v44 }
 0x150   : > { %v1721_v30 = vpop.eup %1720  ;;  %v764_v9 = vmul.f32 %v2245_v36, %v725_v14  ;;  %v620_v42 = vmul.f32 0.03125, %v546_v31  ;;  %v861_v52 = vsel %vm320_vm0, %v2299_v23, 0.0 }
 0x151   : > { %v1723_v10 = vpop.eup %1722  ;;  %v2306_v2 = vadd.f32 %v2253_v7, %v749_v32  ;;  %v711_v47 = vmul.f32 %v1721_v30, %v2051_v13  ;;  %v651_v63 = vadd.f32 1e-05, %v619_v48  ;;  %v822_v13 = vadd.f32 %v821_v39, %v820_v35 }
 0x152   : > { %v2312_v8 = vadd.f32 %v2253_v7, %v764_v9  ;;  %v726_v59 = vmul.f32 %v1723_v10, %v2060_v1  ;;  %v588_v40 = vpop.xlane.xlu1 %587  ;;  %v591_v11 = vpop.xlane.xlu0 %590  ;;  %v862_v28 = vadd.f32 %v861_v52, %v860_v51  ;;  %v652_v1 = vadd.f32 1e-05, %v620_v42 }
 0x153   : > { %v750_v56 = vmul.f32 %v2245_v36, %v711_v47  ;;  %v634_v5 = vmul.f32 0.03125, %v588_v40  ;;  %v823_v58 = vsel %vm320_vm0, %v2306_v2, 0.0  ;;  %1734 = vrsqrt.f32 %v651_v63 }
 0x154   : > { %v1725_v12 = vpop.eup %1724  ;;  %v765_v15 = vmul.f32 %v2245_v36, %v726_v59  ;;  %v863_v44 = vsel %vm320_vm0, %v2312_v8, 0.0  ;;  %1736 = vrsqrt.f32 %v650_v24  ;;  %v635_v30 = vmul.f32 0.03125, %v591_v11 }
 0x155   : > { %v1727_v27 = vpop.eup %1726  ;;  %v2323_v60 = vadd.f32 %v2253_v7, %v750_v56  ;;  %v712_v14 = vmul.f32 %v1725_v12, %v2063_v17  ;;  %v666_v31 = vadd.f32 1e-05, %v634_v5  ;;  %v824_v10 = vadd.f32 %v823_v58, %v822_v13 }
 0x156   : > { %v2329_v26 = vadd.f32 %v2253_v7, %v765_v15  ;;  %v727_v16 = vmul.f32 %v1727_v27, %v2072_v46  ;;  %v549_v32 = vpop.xlane.xlu1 %548  ;;  %v594_v35 = vpop.xlane.xlu0 %593  ;;  %v864_v47 = vadd.f32 %v863_v44, %v862_v28  ;;  %1738 = vrsqrt.f32 %v652_v1 }
 0x157   : > { %v751_v48 = vmul.f32 %v2245_v36, %v712_v14  ;;  %v621_v9 = vmul.f32 0.03125, %v549_v32  ;;  %v636_v17 = vmul.f32 0.03125, %v594_v35  ;;  %v825_v51 = vsel %vm320_vm0, %v2323_v60, 0.0 }
 0x158   : > { %v1729_v39 = vpop.eup %1728  ;;  %v766_v42 = vmul.f32 %v2245_v36, %v727_v16  ;;  %v865_v59 = vsel %vm320_vm0, %v2329_v26, 0.0  ;;  %1740 = vrsqrt.f32 %v666_v31  ;;  %v826_v15 = vadd.f32 %v825_v51, %v824_v10 }
 0x159   : > { %v2337_v46 = vadd.f32 %v2253_v7, %v751_v48  ;;  %v713_v52 = vmul.f32 %v1729_v39, %v2075_v21  ;;  %v1731_v24 = vpop.eup %1730  ;;  %v653_v40 = vadd.f32 1e-05, %v621_v9  ;;  %v668_v11 = vadd.f32 1e-05, %v636_v17 }
 0x15a   : > { %v2343_v63 = vadd.f32 %v2253_v7, %v766_v42  ;;  %v552_v4 = vpop.xlane.xlu1 %551  ;;  %v597_v56 = vpop.xlane.xlu0 %596  ;;  %v728_v12 = vmul.f32 %v1731_v24, %v2084_v62  ;;  %v667_v58 = vadd.f32 1e-05, %v635_v30  ;;  %v866_v14 = vadd.f32 %v865_v59, %v864_v47 }
 0x15b   : > { %v827_v13 = vsel %vm320_vm0, %v2337_v46, 0.0  ;;  %v752_v5 = vmul.f32 %v2245_v36, %v713_v52  ;;  %v622_v21 = vmul.f32 0.03125, %v552_v4  ;;  %1742 = vrsqrt.f32 %v653_v40 }
 0x15c   : > { %v1733_v28 = vpop.eup %1732  ;;  %v767_v27 = vmul.f32 %v2245_v36, %v728_v12  ;;  %v637_v44 = vmul.f32 0.03125, %v597_v56  ;;  %v867_v16 = vsel %vm320_vm0, %v2343_v63, 0.0  ;;  %v828_v31 = vadd.f32 %v827_v13, %v826_v15 }
 0x15d   : > { %v2350_v1 = vadd.f32 %v2253_v7, %v752_v5  ;;  %v729_v32 = vmul.f32 %v1733_v28, %v2087_v25  ;;  %v654_v35 = vadd.f32 1e-05, %v622_v21  ;;  %1744 = vrsqrt.f32 %v668_v11 }
 0x15e   : > { %v555_v62 = vpop.xlane.xlu1 %554  ;;  %v600_v48 = vpop.xlane.xlu0 %599  ;;  %v2359_v9 = vadd.f32 %v2253_v7, %v767_v27  ;;  %v868_v25 = vadd.f32 %v867_v16, %v866_v14  ;;  %v669_v51 = vadd.f32 1e-05, %v637_v44 }
 0x15f   : > { %v829_v30 = vsel %vm320_vm0, %v2350_v1, 0.0  ;;  %v623_v17 = vmul.f32 0.03125, %v555_v62  ;;  %v768_v42 = vmul.f32 %v2245_v36, %v729_v32  ;;  %1746 = vrsqrt.f32 %v654_v35 }
 0x160   : > { %v830_v39 = vadd.f32 %v829_v30, %v828_v31  ;;  %v638_v10 = vmul.f32 0.03125, %v600_v48  ;;  %v869_v47 = vsel %vm320_vm0, %v2359_v9, 0.0  ;;  %v1735_v59 = vpop.eup %1734  ;;  %1748 = vrsqrt.f32 %v667_v58 }
 0x161   : > { %v655_v52 = vadd.f32 1e-05, %v623_v17  ;;  %v2365_v40 = vadd.f32 %v2253_v7, %v768_v42  ;;  %v1737_v56 = vpop.eup %1736  ;;  %v870_v13 = vadd.f32 %v869_v47, %v868_v25  ;;  %v715_v44 = vmul.f32 %v1735_v59, %v2099_v29 }
 0x162   : > { %v831_v24 = vrot.slane %v830_v39, 4  ;;  %v558_v4 = vpop.xlane.xlu1 %557  ;;  %v603_v11 = vpop.xlane.xlu0 %602  ;;  %v670_v5 = vadd.f32 1e-05, %v638_v10  ;;  %v714_v48 = vmul.f32 %v1737_v56, %v2096_v18 }
 0x163   : > { %1750 = vrsqrt.f32 %v655_v52  ;;  %v624_v12 = vmul.f32 0.03125, %v558_v4  ;;  %v871_v15 = vsel %vm320_vm0, %v2365_v40, 0.0  ;;  %v639_v28 = vmul.f32 0.03125, %v603_v11  ;;  %v1739_v27 = vpop.eup %1738 }
 0x164   : > { %v832_v21 = vadd.f32 %v831_v24, %v830_v39  ;;  %v872_v14 = vadd.f32 %v871_v15, %v870_v13  ;;  %1752 = vrsqrt.f32 %v669_v51  ;;  %v754_v10 = vmul.f32 %v2245_v36, %v715_v44 }
 0x165   : > { %v656_v16 = vadd.f32 1e-05, %v624_v12  ;;  %1754 = vrsqrt.f32 %v670_v5  ;;  %v671_v58 = vadd.f32 1e-05, %v639_v28  ;;  %v1741_v35 = vpop.eup %1740  ;;  %v716_v29 = vmul.f32 %v1739_v27, %v2108_v34 }
 0x166   : > { %v833_v31 = vrot.slane %v832_v21, 2  ;;  %v561_v32 = vpop.xlane.xlu1 %560  ;;  %v873_v62 = vrot.slane %v872_v14, 4  ;;  %v606_v30 = vpop.xlane.xlu0 %605  ;;  %v730_v25 = vmul.f32 %v1741_v35, %v2111_v33  ;;  %v753_v59 = vmul.f32 %v2245_v36, %v714_v48 }
 0x167   : > { %1756 = vrsqrt.f32 %v656_v16  ;;  %v625_v47 = vmul.f32 0.03125, %v561_v32  ;;  %v640_v51 = vmul.f32 0.03125, %v606_v30  ;;  %v2377_v5 = vadd.f32 %v2253_v7, %v754_v10 }
 0x168   : > { %v1743_v17 = vpop.eup %1742  ;;  %v834_v39 = vadd.f32 %v833_v31, %v832_v21  ;;  %v874_v42 = vadd.f32 %v873_v62, %v872_v14  ;;  %1758 = vrsqrt.f32 %v671_v58  ;;  %v755_v34 = vmul.f32 %v2245_v36, %v716_v29 }
 0x169   : > { %v717_v24 = vmul.f32 %v1743_v17, %v2123_v37  ;;  %v657_v18 = vadd.f32 1e-05, %v625_v47  ;;  %v672_v11 = vadd.f32 1e-05, %v640_v51  ;;  %v769_v33 = vmul.f32 %v2245_v36, %v730_v25 }
 0x16a   : > { %v875_v52 = vrot.slane %v874_v42, 2  ;;  %v1745_v4 = vpop.eup %1744  ;;  %v835_v13 = vrot.slane %v834_v39, 1  ;;  %v2384_v37 = vadd.f32 %v2253_v7, %v753_v59  ;;  %v609_v27 = vpop.xlane.xlu1 %608  ;;  %v838_v58 = vsel %vm320_vm0, %v2377_v5, 0.0 }
 0x16b   : > { %1760 = vrsqrt.f32 %v657_v18  ;;  %v756_v28 = vmul.f32 %v2245_v36, %v717_v24  ;;  %v732_v44 = vmul.f32 %v1745_v4, %v2132_v3  ;;  %v2395_v62 = vadd.f32 %v2253_v7, %v769_v33 }
 0x16c   : > { %v1747_v56 = vpop.eup %1746  ;;  %v876_v15 = vadd.f32 %v875_v52, %v874_v42  ;;  %1762 = vrsqrt.f32 %v672_v11  ;;  %v836_v16 = vadd.f32 %v835_v13, %v834_v39  ;;  %v641_v48 = vmul.f32 0.03125, %v609_v27 }
 0x16d   : > { %v718_v12 = vmul.f32 %v1747_v56, %v2135_v41  ;;  %v1749_v21 = vpop.eup %1748  ;;  %v2391_v41 = vadd.f32 %v2253_v7, %v755_v34  ;;  %v2399_v39 = vadd.f32 %v2253_v7, %v756_v28  ;;  %v837_v42 = vsel %vm320_vm0, %v2384_v37, 0.0 }
 0x16e   : > { %v877_v17 = vrot.slane %v876_v15, 1  ;;  %v731_v3 = vmul.f32 %v1749_v21, %v2120_v50  ;;  %v771_v47 = vmul.f32 %v2245_v36, %v732_v44  ;;  %v673_v25 = vadd.f32 1e-05, %v641_v48 }
 0x16f   : > { %v757_v31 = vmul.f32 %v2245_v36, %v718_v12  ;;  %v2405_v51 = vmul.f32 0.015625, %v836_v16  ;;  %v840_v24 = vsel %vm320_vm0, %v2391_v41, 0.0  ;;  %v879_v18 = vsel %vm320_vm0, %v2395_v62, 0.0 }
 0x170   : > { %v1751_v14 = vpop.eup %1750  ;;  %v878_v11 = vadd.f32 %v877_v17, %v876_v15  ;;  %v842_v34 = vsel %vm320_vm0, %v2399_v39, 0.0  ;;  %1764 = vrsqrt.f32 %v673_v25  ;;  %v770_v33 = vmul.f32 %v2245_v36, %v731_v3 }
 0x171   : > { %v1753_v32 = vpop.eup %1752  ;;  %v719_v35 = vmul.f32 %v1751_v14, %v2147_v45  ;;  %v839_v45 = vadd.f32 %v838_v58, %v837_v42  ;;  %v2408_v52 = vadd.f32 %v2253_v7, %v757_v31  ;;  %v2428_v12 = vsub.f32 %v2265_v0, %v2405_v51 }
 0x172   : > { %v1755_v30 = vpop.eup %1754  ;;  %v733_v50 = vmul.f32 %v1753_v32, %v2144_v22  ;;  %v2423_v22 = vadd.f32 %v2253_v7, %v771_v47  ;;  %v2437_v16 = vadd.f32 %v2253_v7, %v770_v33  ;;  %v2439_v31 = vmul.f32 0.015625, %v878_v11 }
 0x173   : > { %v758_v29 = vmul.f32 %v2245_v36, %v719_v35  ;;  %v734_v59 = vmul.f32 %v1755_v30, %v2156_v38  ;;  %v841_v38 = vadd.f32 %v840_v24, %v839_v45  ;;  %v844_v21 = vsel %vm320_vm0, %v2408_v52, 0.0 }
 0x174   : > { %v1757_v10 = vpop.eup %1756  ;;  %v772_v15 = vmul.f32 %v2245_v36, %v733_v50  ;;  %v2449_v48 = vsub.f32 %v2258_v61, %v2405_v51  ;;  %v2457_v30 = vsub.f32 %v2306_v2, %v2405_v51  ;;  %v880_v2 = vsel %vm320_vm0, %v2437_v16, 0.0 }
 0x175   : > { %v1759_v4 = vpop.eup %1758  ;;  %v2417_v56 = vadd.f32 %v2253_v7, %v758_v29  ;;  %v720_v13 = vmul.f32 %v1757_v10, %v2159_v49  ;;  %v773_v27 = vmul.f32 %v2245_v36, %v734_v59  ;;  %v843_v44 = vadd.f32 %v842_v34, %v841_v38 }
 0x176   : > { %v735_v14 = vmul.f32 %v1759_v4, %v2168_v54  ;;  %v2453_v54 = vsub.f32 %v2292_v19, %v2405_v51  ;;  %v2460_v3 = vadd.f32 %v2253_v7, %v772_v15  ;;  %v2474_v29 = vsub.f32 %v2276_v20, %v2439_v31 }
 0x177   : > { %v759_v49 = vmul.f32 %v2245_v36, %v720_v13  ;;  %v846_v0 = vsel %vm320_vm0, %v2417_v56, 0.0  ;;  %v845_v17 = vadd.f32 %v844_v21, %v843_v44  ;;  %v2467_v10 = vadd.f32 %v2253_v7, %v773_v27 }
 0x178   : > { %v1761_v28 = vpop.eup %1760  ;;  %v774_v19 = vmul.f32 %v2245_v36, %v735_v14  ;;  %v2478_v45 = vsub.f32 %v2280_v55, %v2439_v31  ;;  %v2489_v50 = vsub.f32 %v2312_v8, %v2439_v31  ;;  %v882_v20 = vsel %vm320_vm0, %v2423_v22, 0.0 }
 0x179   : > { %v2444_v58 = vadd.f32 %v2253_v7, %v759_v49  ;;  %v721_v32 = vmul.f32 %v1761_v28, %v2171_v53  ;;  %v1763_v35 = vpop.eup %1762  ;;  %v847_v47 = vadd.f32 %v846_v0, %v845_v17  ;;  %v881_v4 = vadd.f32 %v880_v2, %v879_v18 }
 0x17a   : > { %v736_v61 = vmul.f32 %v1763_v35, %v2180_v6  ;;  %v2485_v6 = vsub.f32 %v2273_v43, %v2405_v51  ;;  %v937_v11 = vmul.f32 %v2428_v12, %v2428_v12  ;;  %v938_v43 = vmul.f32 %v2449_v48, %v2449_v48 }
 0x17b   : > { %v848_v53 = vsel %vm320_vm0, %v2444_v58, 0.0  ;;  %v760_v42 = vmul.f32 %v2245_v36, %v721_v32  ;;  %v886_v8 = vsel %vm320_vm0, %v2467_v10, 0.0  ;;  %v2503_v13 = vadd.f32 %v2253_v7, %v774_v19 }
 0x17c   : > { %v849_v59 = vadd.f32 %v848_v53, %v847_v47  ;;  %v775_v24 = vmul.f32 %v2245_v36, %v736_v61  ;;  %v884_v38 = vsel %vm320_vm0, %v2460_v3, 0.0  ;;  %v883_v33 = vadd.f32 %v882_v20, %v881_v4 }
 0x17d   : > { %v2481_v25 = vadd.f32 %v2253_v7, %v760_v42  ;;  %v2509_v18 = vsub.f32 %v2323_v60, %v2405_v51  ;;  %v939_v21 = vmul.f32 %v2485_v6, %v2485_v6  ;;  %v953_v15 = vmul.f32 %v2474_v29, %v2474_v29  ;;  %v1765_v44 = vpop.eup %1764 }
 0x17e   : > { %v2516_v28 = vadd.f32 %v2253_v7, %v775_v24  ;;  %v2520_v27 = vsub.f32 %v2299_v23, %v2439_v31  ;;  %v940_v14 = vmul.f32 %v2453_v54, %v2453_v54  ;;  %v885_v60 = vadd.f32 %v884_v38, %v883_v33 }
 0x17f   : > { %v850_v55 = vsel %vm320_vm0, %v2481_v25, 0.0  ;;  %v954_v0 = vmul.f32 %v2478_v45, %v2478_v45  ;;  %v969_v32 = vsel %vm320_vm0, %v937_v11, 0.0  ;;  %v970_v35 = vsel %vm320_vm0, %v938_v43, 0.0 }
 0x180   : > { %v851_v34 = vadd.f32 %v850_v55, %v849_v59  ;;  %v888_v17 = vsel %vm320_vm0, %v2503_v13, 0.0  ;;  %v737_v42 = vmul.f32 %v1765_v44, %v2183_v57  ;;  %v971_v23 = vadd.f32 %v970_v35, %v969_v32 }
 0x181   : > { %v887_v61 = vadd.f32 %v886_v8, %v885_v60  ;;  %v941_v19 = vmul.f32 %v2457_v30, %v2457_v30  ;;  %v972_v47 = vsel %vm320_vm0, %v939_v21, 0.0  ;;  %v1011_v2 = vsel %vm320_vm0, %v953_v15, 0.0 }
 0x182   : > { %v852_v49 = vrot.slane %v851_v34, 4  ;;  %v890_v24 = vsel %vm320_vm0, %v2516_v28, 0.0  ;;  %v776_v20 = vmul.f32 %v2245_v36, %v737_v42  ;;  %v973_v55 = vadd.f32 %v972_v47, %v971_v23 }
 0x183   : > { %v889_v4 = vadd.f32 %v888_v17, %v887_v61  ;;  %v955_v57 = vmul.f32 %v2520_v27, %v2520_v27  ;;  %v974_v11 = vsel %vm320_vm0, %v940_v14, 0.0  ;;  %v1012_v43 = vsel %vm320_vm0, %v954_v0, 0.0 }
 0x184   : > { %v853_v53 = vadd.f32 %v852_v49, %v851_v34  ;;  %v2543_v34 = vadd.f32 %v2253_v7, %v776_v20  ;;  %v975_v38 = vadd.f32 %v974_v11, %v973_v55  ;;  %v1013_v33 = vadd.f32 %v1012_v43, %v1011_v2 }
 0x185   : > { %v2547_v21 = vsub.f32 %v2337_v46, %v2405_v51  ;;  %v891_v36 = vadd.f32 %v890_v24, %v889_v4  ;;  %v2551_v15 = vsub.f32 %v2329_v26, %v2439_v31  ;;  %v942_v44 = vmul.f32 %v2509_v18, %v2509_v18 }
 0x186   : > { %v854_v59 = vrot.slane %v853_v53, 2  ;;  %v892_v14 = vsel %vm320_vm0, %v2543_v34, 0.0  ;;  %v956_v60 = vmul.f32 %v2489_v50, %v2489_v50  ;;  %v976_v0 = vsel %vm320_vm0, %v941_v19, 0.0 }
 0x187   : > { %v893_v7 = vadd.f32 %v892_v14, %v891_v36  ;;  %v1014_v46 = vsel %vm320_vm0, %v955_v57, 0.0  ;;  %v977_v35 = vadd.f32 %v976_v0, %v975_v38  ;;  %v943_v23 = vmul.f32 %v2547_v21, %v2547_v21 }
 0x188   : > { %v855_v8 = vadd.f32 %v854_v59, %v853_v53  ;;  %v1015_v17 = vadd.f32 %v1014_v46, %v1013_v33  ;;  %v2563_v53 = vsub.f32 %v2350_v1, %v2405_v51  ;;  %v957_v61 = vmul.f32 %v2551_v15, %v2551_v15 }
 0x189   : > { %v894_v26 = vrot.slane %v893_v7, 4  ;;  %v978_v19 = vsel %vm320_vm0, %v942_v44, 0.0  ;;  %v1016_v2 = vsel %vm320_vm0, %v956_v60, 0.0  ;;  %v2576_v24 = vsub.f32 %v2343_v63, %v2439_v31 }
 0x18a   : > { %v856_v49 = vrot.slane %v855_v8, 1  ;;  %v979_v1 = vadd.f32 %v978_v19, %v977_v35  ;;  %v1017_v51 = vadd.f32 %v1016_v2, %v1015_v17  ;;  %v944_v57 = vmul.f32 %v2563_v53, %v2563_v53 }
 0x18b   : > { %v895_v47 = vadd.f32 %v894_v26, %v893_v7  ;;  %v1018_v63 = vsel %vm320_vm0, %v957_v61, 0.0  ;;  %v2599_v38 = vsub.f32 %v2359_v9, %v2439_v31  ;;  %v2610_v60 = vsub.f32 %v2365_v40, %v2439_v31 }
 0x18c   : > { %v857_v32 = vadd.f32 %v856_v49, %v855_v8  ;;  %v1019_v36 = vadd.f32 %v1018_v63, %v1017_v51  ;;  %v982_v46 = vsel %vm320_vm0, %v944_v57, 0.0 }
 0x18d   : > { %v896_v20 = vrot.slane %v895_v47, 2  ;;  %v959_v40 = vmul.f32 %v2599_v38, %v2599_v38 }
 0x18e   : > { %v902_v42 = vmul.f32 0.015625, %v857_v32 }
 0x18f   : > { %v897_v43 = vadd.f32 %v896_v20, %v895_v47 }
 0x190   : > { %v2572_v59 = vsub.f32 %v2391_v41, %v902_v42  ;;  %v2579_v55 = vsub.f32 %v2384_v37, %v902_v42  ;;  %v2582_v4 = vsub.f32 %v2377_v5, %v902_v42  ;;  %v2587_v11 = vsub.f32 %v2399_v39, %v902_v42 }
 0x191   : > { %v980_v41 = vsel %vm320_vm0, %v943_v23, 0.0  ;;  %v958_v39 = vmul.f32 %v2576_v24, %v2576_v24  ;;  %v2604_v49 = vsub.f32 %v2408_v52, %v902_v42  ;;  %v898_v14 = vrot.slane %v897_v43, 1 }
 0x192   : > { %v945_v8 = vmul.f32 %v2579_v55, %v2579_v55  ;;  %v946_v37 = vmul.f32 %v2582_v4, %v2582_v4  ;;  %v947_v5 = vmul.f32 %v2572_v59, %v2572_v59  ;;  %v981_v33 = vadd.f32 %v980_v41, %v979_v1  ;;  %v2641_v41 = vpop.permute.xlu1 %1112 }
 0x193   : > { %v948_v9 = vmul.f32 %v2587_v11, %v2587_v11  ;;  %v899_v32 = vadd.f32 %v898_v14, %v897_v43  ;;  %v2616_v35 = vsub.f32 %v2417_v56, %v902_v42  ;;  %v2620_v17 = vsub.f32 %v2444_v58, %v902_v42 }
 0x194   : > { %v990_v44 = vsel %vm320_vm0, %v945_v8, 0.0  ;;  %v991_v7 = vsel %vm320_vm0, %v946_v37, 0.0  ;;  %v993_v52 = vsel %vm320_vm0, %v947_v5, 0.0  ;;  %v1020_v31 = vsel %vm320_vm0, %v958_v39, 0.0 }
 0x195   : > { %v992_v0 = vadd.f32 %v991_v7, %v990_v44  ;;  %v904_v23 = vmul.f32 0.015625, %v899_v32  ;;  %v949_v61 = vmul.f32 %v2604_v49, %v2604_v49  ;;  %v983_v47 = vadd.f32 %v982_v46, %v981_v33 }
 0x196   : > { %v1021_v19 = vadd.f32 %v1020_v31, %v1019_v36  ;;  %v960_v56 = vmul.f32 %v2610_v60, %v2610_v60  ;;  %v995_v2 = vsel %vm320_vm0, %v948_v9, 0.0  ;;  %v2631_v58 = vsub.f32 %v2481_v25, %v902_v42  ;;  %v2680_v31 = vpop.permute.xlu1 %1117 }
 0x197   : > { %v994_v26 = vadd.f32 %v993_v52, %v992_v0  ;;  %v2634_v1 = vsub.f32 %v2423_v22, %v904_v23  ;;  %v950_v51 = vmul.f32 %v2616_v35, %v2616_v35  ;;  %v2639_v57 = vsub.f32 %v2460_v3, %v904_v23 }
 0x198   : > { %v2644_v63 = vsub.f32 %v2395_v62, %v904_v23  ;;  %v2647_v43 = vsub.f32 %v2437_v16, %v904_v23  ;;  %v1022_v25 = vsel %vm320_vm0, %v959_v40, 0.0  ;;  %v951_v22 = vmul.f32 %v2620_v17, %v2620_v17 }
 0x199   : > { %v996_v20 = vadd.f32 %v995_v2, %v994_v26  ;;  %v997_v42 = vsel %vm320_vm0, %v949_v61, 0.0  ;;  %v984_v8 = vrot.slane %v983_v47, 4  ;;  %v1023_v37 = vadd.f32 %v1022_v25, %v1021_v19 }
 0x19a   : > { %v2654_v3 = vsub.f32 %v2467_v10, %v904_v23  ;;  %v961_v5 = vmul.f32 %v2644_v63, %v2644_v63  ;;  %v962_v62 = vmul.f32 %v2647_v43, %v2647_v43  ;;  %v963_v16 = vmul.f32 %v2634_v1, %v2634_v1 }
 0x19b   : > { %v1024_v39 = vsel %vm320_vm0, %v960_v56, 0.0  ;;  %v952_v33 = vmul.f32 %v2631_v58, %v2631_v58  ;;  %v998_v36 = vadd.f32 %v997_v42, %v996_v20  ;;  %v999_v14 = vsel %vm320_vm0, %v950_v51, 0.0 }
 0x19c   : > { %v2667_v10 = vsub.f32 %v2503_v13, %v904_v23  ;;  %v964_v44 = vmul.f32 %v2639_v57, %v2639_v57  ;;  %v1032_v7 = vsel %vm320_vm0, %v961_v5, 0.0  ;;  %v1033_v9 = vsel %vm320_vm0, %v962_v62, 0.0 }
 0x19d   : > { %v1000_v0 = vadd.f32 %v999_v14, %v998_v36  ;;  %v1001_v46 = vsel %vm320_vm0, %v951_v22, 0.0  ;;  %v1034_v32 = vadd.f32 %v1033_v9, %v1032_v7  ;;  %v985_v52 = vadd.f32 %v984_v8, %v983_v47  ;;  %v2695_v14 = vpop.permute.xlu1 %1122 }
 0x19e   : > { %v2675_v26 = vsub.f32 %v2516_v28, %v904_v23  ;;  %v965_v40 = vmul.f32 %v2654_v3, %v2654_v3  ;;  %v1035_v13 = vsel %vm320_vm0, %v963_v16, 0.0  ;;  %v1025_v61 = vadd.f32 %v1024_v39, %v1023_v37 }
 0x19f   : > { %v1003_v19 = vsel %vm320_vm0, %v952_v33, 0.0  ;;  %v1002_v56 = vadd.f32 %v1001_v46, %v1000_v0  ;;  %v1036_v2 = vadd.f32 %v1035_v13, %v1034_v32  ;;  %v986_v51 = vrot.slane %v985_v52, 2 }
 0x1a0   : > { %v2684_v20 = vsub.f32 %v2543_v34, %v904_v23  ;;  %v966_v28 = vmul.f32 %v2667_v10, %v2667_v10  ;;  %v1037_v47 = vsel %vm320_vm0, %v964_v44, 0.0  ;;  %v1026_v25 = vrot.slane %v1025_v61, 4 }
 0x1a1   : > { %v1004_v22 = vadd.f32 %v1003_v19, %v1002_v56  ;;  %v1038_v42 = vadd.f32 %v1037_v47, %v1036_v2  ;;  %v987_v8 = vadd.f32 %v986_v51, %v985_v52  ;;  %v967_v37 = vmul.f32 %v2675_v26, %v2675_v26  ;;  %v2699_v56 = vpop.permute.xlu1 %1187 }
 0x1a2   : > { %v1039_v5 = vsel %vm320_vm0, %v965_v40, 0.0  ;;  %v1027_v62 = vadd.f32 %v1026_v25, %v1025_v61  ;;  %v968_v34 = vmul.f32 %v2684_v20, %v2684_v20  ;;  %v1041_v23 = vsel %vm320_vm0, %v966_v28, 0.0 }
 0x1a3   : > { %v1005_v16 = vrot.slane %v1004_v22, 4  ;;  %v1040_v39 = vadd.f32 %v1039_v5, %v1038_v42  ;;  %v988_v33 = vrot.slane %v987_v8, 1  ;;  %v1043_v9 = vsel %vm320_vm0, %v967_v37, 0.0 }
 0x1a4   : > { %v1028_v36 = vrot.slane %v1027_v62, 2  ;;  %v1045_v52 = vsel %vm320_vm0, %v968_v34, 0.0 }
 0x1a5   : > { %v1006_v44 = vadd.f32 %v1005_v16, %v1004_v22  ;;  %v1042_v7 = vadd.f32 %v1041_v23, %v1040_v39  ;;  %v989_v40 = vadd.f32 %v988_v33, %v987_v8  ;;  %v2701_v37 = vpop.permute.xlu1 %1192 }
 0x1a6   : > { %v1029_v0 = vadd.f32 %v1028_v36, %v1027_v62 }
 0x1a7   : > { %v1007_v46 = vrot.slane %v1006_v44, 2  ;;  %v1044_v32 = vadd.f32 %v1043_v9, %v1042_v7  ;;  %v1053_v28 = vmul.f32 0.015625, %v989_v40  ;;  %v2705_v7 = vpop.permute.xlu0 %1107 }
 0x1a8   : > { %v1030_v19 = vrot.slane %v1029_v0, 1 }
 0x1a9   : > { %v1008_v13 = vadd.f32 %v1007_v46, %v1006_v44  ;;  %v1046_v61 = vadd.f32 %v1045_v52, %v1044_v32  ;;  %v1057_v5 = vadd.f32 1e-05, %v1053_v28  ;;  %v2703_v23 = vpop.permute.xlu1 %1197 }
 0x1aa   : > { %v1031_v25 = vadd.f32 %v1030_v19, %v1029_v0 }
 0x1ab   : > { %v1047_v2 = vrot.slane %v1046_v61, 4  ;;  %v1009_v51 = vrot.slane %v1008_v13, 1  ;;  %1766 = vrsqrt.f32 %v1057_v5  ;;  %v2709_v32 = vpop.permute.xlu0 %1132 }
 0x1ac   : > { %v1055_v16 = vmul.f32 0.015625, %v1031_v25 }
 0x1ad   : > { %v1048_v47 = vadd.f32 %v1047_v2, %v1046_v61  ;;  %v1010_v42 = vadd.f32 %v1009_v51, %v1008_v13  ;;  %v2707_v9 = vpop.permute.xlu1 %1202 }
 0x1ae   : > { %v1059_v8 = vadd.f32 1e-05, %v1055_v16 }
 0x1af   : > { %v1049_v22 = vrot.slane %v1048_v47, 2  ;;  %v1054_v34 = vmul.f32 0.015625, %v1010_v42  ;;  %v2718_v28 = vpop.permute.xlu0 %1142 }
 0x1b0   : > { %1768 = vrsqrt.f32 %v1059_v8 }
 0x1b1   : > { %v1050_v62 = vadd.f32 %v1049_v22, %v1048_v47  ;;  %v1058_v36 = vadd.f32 1e-05, %v1054_v34  ;;  %v2711_v52 = vpop.permute.xlu1 %1127 }
 0x1b3   : > { %v1051_v39 = vrot.slane %v1050_v62, 1  ;;  %1770 = vrsqrt.f32 %v1058_v36 }
 0x1b5   : > { %v1052_v33 = vadd.f32 %v1051_v39, %v1050_v62  ;;  %v2723_v42 = vpop.permute.xlu1 %1137 }
 0x1b7   : > { %v1056_v44 = vmul.f32 0.015625, %v1052_v33 }
 0x1b8   : > { %v1767_v46 = vpop.eup %1766 }
 0x1b9   : > { %v1060_v0 = vadd.f32 1e-05, %v1056_v44  ;;  %v1067_v40 = vmul.f32 %v1767_v46, %v2485_v6  ;;  %v1068_v13 = vmul.f32 %v1767_v46, %v2453_v54  ;;  %v1065_v61 = vmul.f32 %v1767_v46, %v2428_v12 }
 0x1ba   : > { %v1069_v2 = vmul.f32 %v1767_v46, %v2457_v30  ;;  %v1070_v51 = vmul.f32 %v1767_v46, %v2509_v18  ;;  %v1066_v47 = vmul.f32 %v1767_v46, %v2449_v48  ;;  %v1071_v18 = vmul.f32 %v1767_v46, %v2547_v21 }
 0x1bb   : > { %1772 = vrsqrt.f32 %v1060_v0  ;;  %v1147_v25 = vmul.f32 %v2680_v31, %v1067_v40  ;;  %v1148_v22 = vmul.f32 %v2695_v14, %v1068_v13  ;;  %v1145_v54 = vmul.f32 %v2705_v7, %v1065_v61 }
 0x1bc   : > { %v1072_v5 = vmul.f32 %v1767_v46, %v2563_v53  ;;  %v1149_v48 = vmul.f32 %v2711_v52, %v1069_v2  ;;  %v1150_v62 = vmul.f32 %v2709_v32, %v1070_v51  ;;  %v1146_v16 = vmul.f32 %v2641_v41, %v1066_v47  ;;  %v2743_v53 = vpop.permute.xlu0 %1212 }
 0x1bd   : > { %v1769_v19 = vpop.eup %1768  ;;  %v1227_v34 = vadd.f32 %v2703_v23, %v1147_v25  ;;  %v1228_v8 = vadd.f32 %v2707_v9, %v1148_v22  ;;  %v1225_v33 = vadd.f32 %v2699_v56, %v1145_v54  ;;  %v1151_v0 = vmul.f32 %v2723_v42, %v1071_v18 }
 0x1be   : > { %v1083_v12 = vmul.f32 %v1769_v19, %v2520_v27  ;;  %v1084_v30 = vmul.f32 %v1769_v19, %v2489_v50  ;;  %v1085_v27 = vmul.f32 %v1769_v19, %v2551_v15  ;;  %v1086_v21 = vmul.f32 %v1769_v19, %v2576_v24 }
 0x1bf   : > { %v1152_v46 = vmul.f32 %v2718_v28, %v1072_v5  ;;  %v1230_v24 = vadd.f32 %v2743_v53, %v1150_v62  ;;  %v1226_v40 = vadd.f32 %v2701_v37, %v1146_v16  ;;  %v1258_v51 = vpack.c.bf16 %v1228_v8, %v1227_v34 }
 0x1c0   : > { %v2725_v6 = vpop.eup %1770  ;;  %v1163_v36 = vmul.f32 %v2680_v31, %v1083_v12  ;;  %v1164_v44 = vmul.f32 %v2695_v14, %v1084_v30  ;;  %v1165_v2 = vmul.f32 %v2711_v52, %v1085_v27  ;;  %v1081_v47 = vmul.f32 %v1769_v19, %v2474_v29  ;;  %v2772_v62 = vpop.permute.xlu0 %1222 }
 0x1c1   : > { %v1074_v39 = vmul.f32 %v2725_v6, %v2582_v4  ;;  %v1073_v50 = vmul.f32 %v2725_v6, %v2579_v55  ;;  %v2748_v4 = vpop.permute.xlu1 %1207  ;;  %v1087_v55 = vmul.f32 %v1769_v19, %v2599_v38  ;;  %v1166_v22 = vmul.f32 %v2709_v32, %v1086_v21 }
 0x1c2   : > { %v1229_v15 = vadd.f32 %v2748_v4, %v1149_v48  ;;  %v1257_v54 = vpack.c.bf16 %v1226_v40, %v1225_v33  ;;  %v1082_v38 = vmul.f32 %v1769_v19, %v2478_v45  ;;  %v1243_v12 = vadd.f32 %v2703_v23, %v1163_v36 }
 0x1c3   : > { %v1154_v61 = vmul.f32 %v2641_v41, %v1074_v39  ;;  %v1153_v25 = vmul.f32 %v2705_v7, %v1073_v50  ;;  %v1244_v30 = vadd.f32 %v2707_v9, %v1164_v44  ;;  %v1088_v18 = vmul.f32 %v1769_v19, %v2610_v60 }
 0x1c4   : > { %v1161_v5 = vmul.f32 %v2705_v7, %v1081_v47  ;;  %1653 = vmatprep.mubr.msk.bf16.mxu0 %vm320_vm0, %v1257_v54  ;;  %v1259_v16 = vpack.c.bf16 %v1230_v24, %v1229_v15  ;;  %v1162_v45 = vmul.f32 %v2641_v41, %v1082_v38  ;;  %v1075_v39 = vmul.f32 %v2725_v6, %v2572_v59 }
 0x1c5   : > { %v1076_v60 = vmul.f32 %v2725_v6, %v2587_v11  ;;  %v1245_v19 = vadd.f32 %v2748_v4, %v1165_v2  ;;  %1654 = vmatmul.mubr.msk.bf16.vlgmr.msra.gmra.mxu0 %vm320_vm0, %v1258_v51  ;;  %v1233_v34 = vadd.f32 %v2699_v56, %v1153_v25  ;;  %v2785_v8 = vpop.permute.xlu1 %1217  ;;  %v1246_v27 = vadd.f32 %v2743_v53, %v1166_v22 }
 0x1c6   : > { %1657 = vmatprep.mubr.msk.bf16.mxu0 %vm320_vm0, %v1259_v16  ;;  %v1242_v59 = vadd.f32 %v2701_v37, %v1162_v45  ;;  %v1077_v11 = vmul.f32 %v2725_v6, %v2604_v49  ;;  %v1231_v50 = vadd.f32 %v2785_v8, %v1151_v0  ;;  %v1232_v21 = vadd.f32 %v2772_v62, %v1152_v46 }
 0x1c7   : > { %v1266_v33 = vpack.c.bf16 %v1244_v30, %v1243_v12  ;;  %v1078_v15 = vmul.f32 %v2725_v6, %v2616_v35  ;;  %v1155_v40 = vmul.f32 %v2680_v31, %v1075_v39  ;;  %v1167_v2 = vmul.f32 %v2723_v42, %v1087_v55 }
 0x1c8   : > { %v2756_v13 = vpop.eup %1772  ;;  %v1168_v49 = vmul.f32 %v2718_v28, %v1088_v18  ;;  %v1267_v0 = vpack.c.bf16 %v1246_v27, %v1245_v19  ;;  %v1260_v35 = vpack.c.bf16 %v1232_v21, %v1231_v50  ;;  %v1157_v47 = vmul.f32 %v2711_v52, %v1077_v11 }
 0x1c9   : > { %v1090_v48 = vmul.f32 %v2756_v13, %v2647_v43  ;;  %v1089_v29 = vmul.f32 %v2756_v13, %v2644_v63  ;;  %v1241_v43 = vadd.f32 %v2699_v56, %v1161_v5  ;;  %v1234_v63 = vadd.f32 %v2701_v37, %v1154_v61 }
 0x1ca   : > { %v1156_v61 = vmul.f32 %v2695_v14, %v1076_v60  ;;  %v1158_v25 = vmul.f32 %v2709_v32, %v1078_v15  ;;  %v1235_v22 = vadd.f32 %v2703_v23, %v1155_v40  ;;  %v1247_v54 = vadd.f32 %v2785_v8, %v1167_v2 }
 0x1cb   : > { %v1170_v36 = vmul.f32 %v2641_v41, %v1090_v48  ;;  %v1169_v44 = vmul.f32 %v2705_v7, %v1089_v29  ;;  %v1265_v24 = vpack.c.bf16 %v1242_v59, %v1241_v43  ;;  %v1261_v46 = vpack.c.bf16 %v1234_v63, %v1233_v34 }
 0x1cc   : > { %v1091_v41 = vmul.f32 %v2756_v13, %v2634_v1  ;;  %v1092_v7 = vmul.f32 %v2756_v13, %v2639_v57  ;;  %v1236_v1 = vadd.f32 %v2707_v9, %v1156_v61  ;;  %v1248_v57 = vadd.f32 %v2772_v62, %v1168_v49 }
 0x1cd   : > { %1669 = vmatprep.mubr.msk.bf16.mxu1 %vm320_vm0, %v1265_v24  ;;  %v1250_v51 = vadd.f32 %v2701_v37, %v1170_v36  ;;  %v1249_v55 = vadd.f32 %v2699_v56, %v1169_v44  ;;  %1658 = vmatmul.mubr.msk.bf16.gmra.mxu0 %vm320_vm0, %v1260_v35  ;;  %v1093_v37 = vmul.f32 %v2756_v13, %v2654_v3 }
 0x1ce   : > { %1670 = vmatmul.mubr.msk.bf16.vlgmr.msra.gmra.mxu1 %vm320_vm0, %v1266_v33  ;;  %v1094_v56 = vmul.f32 %v2756_v13, %v2667_v10  ;;  %1661 = vmatprep.mubr.msk.bf16.mxu0 %vm320_vm0, %v1261_v46  ;;  %v1171_v38 = vmul.f32 %v2680_v31, %v1091_v41  ;;  %v1172_v12 = vmul.f32 %v2695_v14, %v1092_v7 }
 0x1cf   : > { %1673 = vmatprep.mubr.msk.bf16.mxu1 %vm320_vm0, %v1267_v0  ;;  %v1079_v30 = vmul.f32 %v2725_v6, %v2620_v17  ;;  %v1080_v18 = vmul.f32 %v2725_v6, %v2631_v58  ;;  %v1237_v5 = vadd.f32 %v2748_v4, %v1157_v47  ;;  %v1238_v48 = vadd.f32 %v2743_v53, %v1158_v25 }
 0x1d0   : > { %v1269_v3 = vpack.c.bf16 %v1250_v51, %v1249_v55  ;;  %v1268_v29 = vpack.c.bf16 %v1248_v57, %v1247_v54  ;;  %v1262_v16 = vpack.c.bf16 %v1236_v1, %v1235_v22  ;;  %v1173_v10 = vmul.f32 %v2711_v52, %v1093_v37 }
 0x1d1   : > { %v1174_v45 = vmul.f32 %v2709_v32, %v1094_v56  ;;  %v1251_v31 = vadd.f32 %v2703_v23, %v1171_v38  ;;  %v1252_v14 = vadd.f32 %v2707_v9, %v1172_v12  ;;  %v1159_v17 = vmul.f32 %v2723_v42, %v1079_v30 }
 0x1d2   : > { %v1160_v39 = vmul.f32 %v2718_v28, %v1080_v18  ;;  %v1263_v58 = vpack.c.bf16 %v1238_v48, %v1237_v5  ;;  %v1095_v6 = vmul.f32 %v2756_v13, %v2675_v26  ;;  %v1096_v52 = vmul.f32 %v2756_v13, %v2684_v20 }
 0x1d3   : > { %v1253_v23 = vadd.f32 %v2748_v4, %v1173_v10  ;;  %v1254_v9 = vadd.f32 %v2743_v53, %v1174_v45  ;;  %v1239_v32 = vadd.f32 %v2785_v8, %v1159_v17  ;;  %v1270_v19 = vpack.c.bf16 %v1252_v14, %v1251_v31 }
 0x1d4   : > { %v1240_v60 = vadd.f32 %v2772_v62, %v1160_v39  ;;  %v1175_v43 = vmul.f32 %v2723_v42, %v1095_v6  ;;  %v1176_v26 = vmul.f32 %v2718_v28, %v1096_v52  ;;  %v2860_v42 = vld [vmem:[%s2974_s6] ss:$0 sm:$0xff] }
 0x1d5   : > { %1662 = vmatmul.mubr.msk.bf16.gmra.mxu0 %vm320_vm0, %v1262_v16  ;;  %v1271_v63 = vpack.c.bf16 %v1254_v9, %v1253_v23 }
 0x1d6   : > { %1674 = vmatmul.mubr.msk.bf16.gmra.mxu1 %vm320_vm0, %v1268_v29  ;;  %1665 = vmatprep.mubr.msk.bf16.mxu0 %vm320_vm0, %v1263_v58  ;;  %v1264_v20 = vpack.c.bf16 %v1240_v60, %v1239_v32  ;;  %v1255_v53 = vadd.f32 %v2785_v8, %v1175_v43  ;;  %v1256_v4 = vadd.f32 %v2772_v62, %v1176_v26 }
 0x1d7   : > { %1677 = vmatprep.mubr.msk.bf16.mxu1 %vm320_vm0, %v1269_v3 }
 0x1d8   : > { %v1272_v13 = vpack.c.bf16 %v1256_v4, %v1255_v53 }
 0x1dd   : > { %1666 = vmatmul.mubr.msk.bf16.gmra.mxu0 %vm320_vm0, %v1264_v20 }
 0x1de   : > { %1678 = vmatmul.mubr.msk.bf16.gmra.mxu1 %vm320_vm0, %v1270_v19 }
 0x1df   : > { %1681 = vmatprep.mubr.msk.bf16.mxu1 %vm320_vm0, %v1271_v63 }
 0x1e6   : > { %1682 = vmatmul.mubr.msk.bf16.gmra.mxu1 %vm320_vm0, %v1272_v13 }
 0x285   : > { %v1655_v28 = vpop.f32.mrf.mxu0 }
 0x286   : > { %v1387_v62 = vadd.f32 %v1655_v28, %v2860_v42 }
 0x287   : > { %v1378_v34 = vpop.f32.mrf.mxu0 }
 0x288   : > { %1507 = vst.msk [vmem:[%s2867_s12 + $0x10] sm:$0xff] %vm320_vm0, %v1387_v62  ;;  %v1379_v8 = vadd.f32 %v2860_v42, %v1378_v34 }
 0x289   : > { %v1656_v27 = vpop.f32.mrf.mxu0 }
 0x28a   : > { %1505 = vst.msk [vmem:[%s2867_s12] sm:$0xff] %vm320_vm0, %v1379_v8  ;;  %v1390_v59 = vadd.f32 %v1656_v27, %v2860_v42 }
 0x28b   : > { %v1381_v50 = vpop.f32.mrf.mxu0 }
 0x28c   : > { %1508 = vst.msk [vmem:[%s2867_s12 + $0x18] sm:$0xff] %vm320_vm0, %v1390_v59  ;;  %v1382_v21 = vadd.f32 %v2860_v42, %v1381_v50 }
 0x28d   : > { %v1659_v36 = vpop.f32.mrf.mxu0 }
 0x28e   : > { %v1671_v11 = vpop.f32.mrf.mxu1  ;;  %1506 = vst.msk [vmem:[%s2867_s12 + $0x8] sm:$0xff] %vm320_vm0, %v1382_v21  ;;  %v1403_v44 = vadd.f32 %v1659_v36, %v2860_v42 }
 0x28f   : > { %v1394_v24 = vpop.f32.mrf.mxu0  ;;  %v1451_v47 = vadd.f32 %v1671_v11, %v2860_v42 }
 0x290   : > { %v1442_v33 = vpop.f32.mrf.mxu1  ;;  %1511 = vst.msk [vmem:[%s2867_s12 + $0x30] sm:$0xff] %vm320_vm0, %v1403_v44  ;;  %v1395_v40 = vadd.f32 %v2860_v42, %v1394_v24 }
 0x291   : > { %v1660_v2 = vpop.f32.mrf.mxu0  ;;  %v1443_v1 = vadd.f32 %v2860_v42, %v1442_v33  ;;  %1523 = vst.msk [vmem:[%s2867_s12 + $0x90] sm:$0xff] %vm320_vm0, %v1451_v47 }
 0x292   : > { %v1672_v15 = vpop.f32.mrf.mxu1  ;;  %1509 = vst.msk [vmem:[%s2867_s12 + $0x20] sm:$0xff] %vm320_vm0, %v1395_v40  ;;  %v1406_v49 = vadd.f32 %v1660_v2, %v2860_v42 }
 0x293   : > { %v1397_v46 = vpop.f32.mrf.mxu0  ;;  %v1454_v56 = vadd.f32 %v1672_v15, %v2860_v42  ;;  %1521 = vst.msk [vmem:[%s2867_s12 + $0x80] sm:$0xff] %vm320_vm0, %v1443_v1 }
 0x294   : > { %v1445_v61 = vpop.f32.mrf.mxu1  ;;  %1512 = vst.msk [vmem:[%s2867_s12 + $0x38] sm:$0xff] %vm320_vm0, %v1406_v49  ;;  %v1398_v41 = vadd.f32 %v2860_v42, %v1397_v46 }
 0x295   : > { %v1663_v35 = vpop.f32.mrf.mxu0  ;;  %v1446_v5 = vadd.f32 %v2860_v42, %v1445_v61  ;;  %1524 = vst.msk [vmem:[%s2867_s12 + $0x98] sm:$0xff] %vm320_vm0, %v1454_v56 }
 0x296   : > { %v1675_v0 = vpop.f32.mrf.mxu1  ;;  %1510 = vst.msk [vmem:[%s2867_s12 + $0x28] sm:$0xff] %vm320_vm0, %v1398_v41  ;;  %v1419_v51 = vadd.f32 %v1663_v35, %v2860_v42 }
 0x297   : > { %v1410_v25 = vpop.f32.mrf.mxu0  ;;  %v1467_v10 = vadd.f32 %v1675_v0, %v2860_v42  ;;  %1522 = vst.msk [vmem:[%s2867_s12 + $0x88] sm:$0xff] %vm320_vm0, %v1446_v5 }
 0x298   : > { %v1458_v7 = vpop.f32.mrf.mxu1  ;;  %1515 = vst.msk [vmem:[%s2867_s12 + $0x50] sm:$0xff] %vm320_vm0, %v1419_v51  ;;  %v1411_v22 = vadd.f32 %v2860_v42, %v1410_v25 }
 0x299   : > { %v1664_v57 = vpop.f32.mrf.mxu0  ;;  %v1459_v39 = vadd.f32 %v2860_v42, %v1458_v7  ;;  %1527 = vst.msk [vmem:[%s2867_s12 + $0xb0] sm:$0xff] %vm320_vm0, %v1467_v10 }
 0x29a   : > { %v1676_v55 = vpop.f32.mrf.mxu1  ;;  %1513 = vst.msk [vmem:[%s2867_s12 + $0x40] sm:$0xff] %vm320_vm0, %v1411_v22  ;;  %v1422_v37 = vadd.f32 %v1664_v57, %v2860_v42 }
 0x29b   : > { %v1413_v12 = vpop.f32.mrf.mxu0  ;;  %v1470_v9 = vadd.f32 %v1676_v55, %v2860_v42  ;;  %1525 = vst.msk [vmem:[%s2867_s12 + $0xa0] sm:$0xff] %vm320_vm0, %v1459_v39 }
 0x29c   : > { %v1461_v54 = vpop.f32.mrf.mxu1  ;;  %1516 = vst.msk [vmem:[%s2867_s12 + $0x58] sm:$0xff] %vm320_vm0, %v1422_v37  ;;  %v1414_v18 = vadd.f32 %v2860_v42, %v1413_v12 }
 0x29d   : > { %v1667_v3 = vpop.f32.mrf.mxu0  ;;  %v1462_v26 = vadd.f32 %v2860_v42, %v1461_v54  ;;  %1528 = vst.msk [vmem:[%s2867_s12 + $0xb8] sm:$0xff] %vm320_vm0, %v1470_v9 }
 0x29e   : > { %v1679_v38 = vpop.f32.mrf.mxu1  ;;  %1514 = vst.msk [vmem:[%s2867_s12 + $0x48] sm:$0xff] %vm320_vm0, %v1414_v18  ;;  %v1435_v16 = vadd.f32 %v1667_v3, %v2860_v42 }
 0x29f   : > { %v1483_v30 = vadd.f32 %v1679_v38, %v2860_v42  ;;  %v1426_v31 = vpop.f32.mrf.mxu0  ;;  %1526 = vst.msk [vmem:[%s2867_s12 + $0xa8] sm:$0xff] %vm320_vm0, %v1462_v26 }
 0x2a0   : > { %v1474_v48 = vpop.f32.mrf.mxu1  ;;  %1519 = vst.msk [vmem:[%s2867_s12 + $0x70] sm:$0xff] %vm320_vm0, %v1435_v16  ;;  %v1427_v17 = vadd.f32 %v2860_v42, %v1426_v31 }
 0x2a1   : > { %1531 = vst.msk [vmem:[%s2867_s12 + $0xd0] sm:$0xff] %vm320_vm0, %v1483_v30  ;;  %v1475_v29 = vadd.f32 %v2860_v42, %v1474_v48  ;;  %v1668_v6 = vpop.f32.mrf.mxu0 }
 0x2a2   : > { %v1680_v45 = vpop.f32.mrf.mxu1  ;;  %1517 = vst.msk [vmem:[%s2867_s12 + $0x60] sm:$0xff] %vm320_vm0, %v1427_v17  ;;  %v1438_v23 = vadd.f32 %v1668_v6, %v2860_v42 }
 0x2a3   : > { %1529 = vst.msk [vmem:[%s2867_s12 + $0xc0] sm:$0xff] %vm320_vm0, %v1475_v29  ;;  %v1486_v14 = vadd.f32 %v1680_v45, %v2860_v42  ;;  %v1429_v60 = vpop.f32.mrf.mxu0 }
 0x2a4   : > { %v1477_v58 = vpop.f32.mrf.mxu1  ;;  %1520 = vst.msk [vmem:[%s2867_s12 + $0x78] sm:$0xff] %vm320_vm0, %v1438_v23  ;;  %v1430_v43 = vadd.f32 %v2860_v42, %v1429_v60 }
 0x2a5   : > { %1532 = vst.msk [vmem:[%s2867_s12 + $0xd8] sm:$0xff] %vm320_vm0, %v1486_v14  ;;  %v1478_v52 = vadd.f32 %v2860_v42, %v1477_v58 }
 0x2a6   : > { %v1683_v32 = vpop.f32.mrf.mxu1  ;;  %1518 = vst.msk [vmem:[%s2867_s12 + $0x68] sm:$0xff] %vm320_vm0, %v1430_v43 }
 0x2a7   : > { %1530 = vst.msk [vmem:[%s2867_s12 + $0xc8] sm:$0xff] %vm320_vm0, %v1478_v52  ;;  %v1499_v19 = vadd.f32 %v1683_v32, %v2860_v42 }
 0x2a8   : > { %v1490_v63 = vpop.f32.mrf.mxu1 }
 0x2a9   : > { %1535 = vst.msk [vmem:[%s2867_s12 + $0xf0] sm:$0xff] %vm320_vm0, %v1499_v19  ;;  %v1491_v20 = vadd.f32 %v2860_v42, %v1490_v63 }
 0x2aa   : > { %v1684_v53 = vpop.f32.mrf.mxu1 }
 0x2ab   : > { %1533 = vst.msk [vmem:[%s2867_s12 + $0xe0] sm:$0xff] %vm320_vm0, %v1491_v20  ;;  %v1502_v4 = vadd.f32 %v1684_v53, %v2860_v42 }
 0x2ac   : > { %v1493_v13 = vpop.f32.mrf.mxu1 }
 0x2ad   : > { %1536 = vst.msk [vmem:[%s2867_s12 + $0xf8] sm:$0xff] %vm320_vm0, %v1502_v4  ;;  %v1494_v28 = vadd.f32 %v2860_v42, %v1493_v13 }
 0x2af   : > { %1534 = vst.msk [vmem:[%s2867_s12 + $0xe8] sm:$0xff] %vm320_vm0, %v1494_v28 }
 0x2b0 PF: > { %s17_s24 = sadd.s32 1, %s1780_s24  }
 0x2b1   : > { %p14_p4 = scmp.ge.s32.totalorder %s17_s24, 4  }
 0x2b3   :  { %16 = sbr.rel (!%p14_p4) target bundleno = 1 (0x1), region = 78 }

</bundles_post_ra>
